<compile_context>
chip_gen: v6e
topology: v6e:2x2x1
jax: 0.10.0
libtpu: 0.0.40
codegen_flags: <defaults>
</compile_context>

<pallas_src>
import functools

import jax
import jax.numpy as jnp
from jax import lax
from jax.experimental import pallas as pl
from jax.experimental.pallas import tpu as pltpu

_SUBLANE = 8
_LANES = 128
_MAX_BLK_ROWS = 256          # v6e/v7x MXU-friendly; fine (if slightly big) on v5e
_MAX_T_CHUNK = 64            # recurrence steps per grid step
_XP_BUDGET_BYTES = 16 << 20  # cap for the f32 chunk input-projection scratch


def _round_up(x, m):
    return ((x + m - 1) // m) * m


def _cdiv(a, b):
    return (a + b - 1) // b


def lstm_kernel(x_ref, wih_ref, whh_ref, b_ref, wfc_ref, bfc_ref,
                out_ref, xp_ref, h_ref, c_ref, *, T, Tc, unroll):
    """One (batch block, time chunk) grid step.

    x_ref   : (Tc*Bb, E)   compute dtype, row = local_t*Bb + b_local
    wih_ref : (E, 4Hp)     gate order [i,f,o,g], lane-aligned groups
    whh_ref : (Hp, 4Hp)
    b_ref   : (1, 4Hp)     b_ih + b_hh folded, f32
    wfc_ref : (Hp, NOUT)   fc weight, lane padded
    bfc_ref : (1, NOUT)    fc bias, lane padded, f32
    out_ref : (Bb, NOUT)   logits in column 0 (written on last time chunk)
    xp_ref  : (Tc*Bb, 4Hp) f32 scratch: per-chunk input projection
    h_ref, c_ref : (Bb, Hp) f32 scratch: recurrent state carried across chunks
    """
    Hp = whh_ref.shape[0]
    Bb = out_ref.shape[0]
    cdt = wih_ref.dtype
    t_chunk = pl.program_id(1)

    @pl.when(t_chunk == 0)
    def _():
        h_ref[...] = jnp.zeros_like(h_ref)
        c_ref[...] = jnp.zeros_like(c_ref)

    # Per-chunk hoisted input projection: ONE MXU GEMM (+ folded bias) into an
    # f32 scratch (kept f32 so gate pre-activations are never quantized).
    xp_ref[...] = (
        jnp.dot(x_ref[...], wih_ref[...], preferred_element_type=jnp.float32)
        + b_ref[...])

    whh = whh_ref[...]                    # hoist weight load out of time loop
    t0 = t_chunk * Tc

    def step(lt, carry):
        h, c = carry                      # (Bb, Hp) f32
        row = pl.multiple_of(lt * Bb, _SUBLANE)
        xg = xp_ref[pl.ds(row, Bb), :]    # precomputed x part for this step
        gates = xg + jnp.dot(h.astype(cdt), whh,
                             preferred_element_type=jnp.float32)
        # sigmoid(x) = 0.5*tanh(0.5*x)+0.5 : single EUP push (tanh) instead of
        # exp + reciprocal; the scale/add rides the VALU which has slack.
        ifo = 0.5 * jnp.tanh(0.5 * gates[:, :3 * Hp]) + 0.5   # [i, f, o]
        g_g = jnp.tanh(gates[:, 3 * Hp:])
        i_g = ifo[:, :Hp]
        f_g = ifo[:, Hp:2 * Hp]
        o_g = ifo[:, 2 * Hp:]
        c_new = f_g * c + i_g * g_g
        h_new = o_g * jnp.tanh(c_new)
        if T % Tc != 0:
            # mask padded tail timesteps (only present when Tc doesn't divide T)
            keep = (t0 + lt) < T
            h_new = jnp.where(keep, h_new, h)
            c_new = jnp.where(keep, c_new, c)
        return h_new, c_new

    # TODO(synk): interleave two independent batch sub-blocks in this loop to
    # further hide the serial dot->tanh latency chain.
    h_T, c_T = lax.fori_loop(0, Tc, step, (h_ref[...], c_ref[...]),
                             unroll=unroll)
    h_ref[...] = h_T
    c_ref[...] = c_T

    @pl.when(t_chunk == pl.num_programs(1) - 1)
    def _():
        out_ref[...] = (
            jnp.dot(h_T.astype(wfc_ref.dtype), wfc_ref[...],
                    preferred_element_type=jnp.float32)
            + bfc_ref[...]).astype(out_ref.dtype)


@functools.partial(jax.jit, static_argnames=("compute_dtype",))
def lstm_sentiment_forward(token_ids, params, compute_dtype=jnp.bfloat16):
    """token_ids: (B, T) int32. Returns (B, 1) float32 logits.

    bf16 weights / MXU feeds by default (v6e/v7x win); accumulation, gates and
    h/c stay f32 (v5e-safe).
    # TODO(synk): revalidate bf16 vs f32 drift at production sequence lengths.
    """
    emb_table = params["embedding"]          # (V, E)
    W_ih, W_hh, b = params["W_ih"], params["W_hh"], params["b"]
    W_fc, b_fc = params["W_fc"], params["b_fc"]

    B, T = token_ids.shape
    E = emb_table.shape[1]
    H = W_hh.shape[0]
    Hp = _round_up(H, _LANES)               # lane-align every gate group
    NOUT = _LANES                           # lane-dense fc output (sliced back)

    # --- gate-column permutation [i,f,g,o] -> [i,f,o,g] + per-group pad H->Hp
    # (padded units stay exactly 0 through the recurrence: zero W/b columns).
    def reorder_pad(w):
        i, f, g, o = jnp.split(w, 4, axis=-1)
        pad = [(0, 0)] * (w.ndim - 1) + [(0, Hp - H)]
        return jnp.concatenate([jnp.pad(p, pad) for p in (i, f, o, g)], -1)

    wih_k = reorder_pad(W_ih).astype(compute_dtype)                  # (E, 4Hp)
    whh_k = jnp.pad(reorder_pad(W_hh),
                    ((0, Hp - H), (0, 0))).astype(compute_dtype)     # (Hp, 4Hp)
    b_k = reorder_pad(b).astype(jnp.float32)                         # (1, 4Hp)
    wfc_k = jnp.pad(W_fc, ((0, Hp - H),
                           (0, NOUT - W_fc.shape[1]))).astype(compute_dtype)
    bfc_k = jnp.pad(b_fc, ((0, 0),
                           (0, NOUT - b_fc.shape[1]))).astype(jnp.float32)

    # --- batch blocking: sublane aligned, <=256 rows/block, and >=2 blocks
    # whenever the batch allows so "parallel" shards across v7x's 2 TCs.
    B_pad8 = _round_up(B, _SUBLANE)
    if B_pad8 <= _SUBLANE:
        nb, B_blk = 1, B_pad8
    elif B_pad8 <= 2 * _MAX_BLK_ROWS:
        nb = 2
        B_blk = _round_up(_cdiv(B_pad8, 2), _SUBLANE)
    else:
        B_blk = _MAX_BLK_ROWS
        nb = _cdiv(B_pad8, B_blk)
    B_pad = nb * B_blk

    # --- time chunking: VMEM residency O(Tc*B_blk*(E+4Hp)); balance chunks so
    # tail padding is minimal.
    tc_cap = max(1, _XP_BUDGET_BYTES // (B_blk * 4 * Hp * 4))
    Tc_max = max(1, min(_MAX_T_CHUNK, tc_cap, T))
    nT = _cdiv(T, Tc_max)
    Tc = _cdiv(T, nT)
    T_pad = nT * Tc

    # --- layout-transform the int32 ids BEFORE the gather: jnp.take then
    # writes the final (nb, nT, Tc*B_blk, E) compute-dtype layout directly.
    ids = jnp.pad(token_ids, ((0, B_pad - B), (0, T_pad - T)))
    ids = (ids.reshape(nb, B_blk, nT, Tc)
              .transpose(0, 2, 3, 1)
              .reshape(nb, nT, Tc * B_blk))
    # TODO(synk): the nn.Embedding gather itself stays in XLA (jnp.take);
    # a DMA-gather Pallas kernel is not worthwhile here.
    x = jnp.take(emb_table.astype(compute_dtype), ids, axis=0)

    # --- explicit VMEM limit sized from the actual blocks (with headroom).
    c_bytes = jnp.dtype(compute_dtype).itemsize
    est_vmem = (2 * Tc * B_blk * E * c_bytes                   # x (double buf)
                + (E + Hp) * 4 * Hp * c_bytes + 4 * Hp * 4     # W_ih/W_hh/b
                + Hp * NOUT * c_bytes + NOUT * 4               # fc weight/bias
                + 2 * B_blk * NOUT * 4                         # out (double buf)
                + Tc * B_blk * 4 * Hp * 4                      # xp scratch
                + 2 * B_blk * Hp * 4)                          # h, c carries
    vmem_limit = int(min(max(int(est_vmem * 1.25) + (2 << 20), 16 << 20),
                         100 << 20))

    unroll = Tc if Tc <= 16 else 8
    kernel = functools.partial(lstm_kernel, T=T, Tc=Tc, unroll=unroll)

    const = lambda i, t: (0, 0)
    grid_spec = pltpu.PrefetchScalarGridSpec(
        num_scalar_prefetch=0,
        grid=(nb, nT),                       # (batch blocks, time chunks)
        in_specs=[
            pl.BlockSpec((pl.Squeezed(), pl.Squeezed(), Tc * B_blk, E),
                         lambda i, t: (i, t, 0, 0)),            # x chunk
            # weights: fetched once (constant index map) -> single-buffered
            pl.BlockSpec((E, 4 * Hp), const, pipeline_mode=pl.Buffered(1)),
            pl.BlockSpec((Hp, 4 * Hp), const, pipeline_mode=pl.Buffered(1)),
            pl.BlockSpec((1, 4 * Hp), const, pipeline_mode=pl.Buffered(1)),
            pl.BlockSpec((Hp, NOUT), const, pipeline_mode=pl.Buffered(1)),
            pl.BlockSpec((1, NOUT), const, pipeline_mode=pl.Buffered(1)),
        ],
        out_specs=pl.BlockSpec((B_blk, NOUT), lambda i, t: (i, 0)),
        scratch_shapes=[
            pltpu.VMEM((Tc * B_blk, 4 * Hp), jnp.float32),     # chunk x-proj
            pltpu.VMEM((B_blk, Hp), jnp.float32),              # h carry
            pltpu.VMEM((B_blk, Hp), jnp.float32),              # c carry
        ],
    )

    out_padded = pl.pallas_call(
        kernel,
        out_shape=jax.ShapeDtypeStruct((B_pad, NOUT), jnp.float32),
        grid_spec=grid_spec,
        compiler_params=pltpu.CompilerParams(
            dimension_semantics=("parallel", "arbitrary"),
            vmem_limit_bytes=vmem_limit),
    )(x, wih_k, whh_k, b_k, wfc_k, bfc_k)

    return out_padded[:B, :1]


def init_params(key, vocab_size, embedding_dim, hidden_dim):
    ks = jax.random.split(key, 7)
    scale = 0.1
    return {
        "embedding": scale * jax.random.normal(
            ks[0], (vocab_size, embedding_dim), jnp.float32),
        # PyTorch gate order [i, f, g, o]; wrapper permutes to [i, f, o, g].
        "W_ih": scale * jax.random.normal(
            ks[1], (embedding_dim, 4 * hidden_dim), jnp.float32),
        "W_hh": scale * jax.random.normal(
            ks[2], (hidden_dim, 4 * hidden_dim), jnp.float32),
        # b = b_ih + b_hh folded
        "b": scale * jax.random.normal(
            ks[3], (1, 4 * hidden_dim), jnp.float32),
        "W_fc": scale * jax.random.normal(
            ks[4], (hidden_dim, 1), jnp.float32),
        "b_fc": scale * jax.random.normal(
            ks[5], (1, 1), jnp.float32),
    }


def reference_forward(token_ids, params):
    """Pure-JAX reference mirroring PyTorch LSTM semantics (gate order i,f,g,o)."""
    emb = jnp.take(params["embedding"], token_ids, axis=0)   # (B, T, E)
    B, T, E = emb.shape
    H = params["W_hh"].shape[0]
    h = jnp.zeros((B, H), jnp.float32)
    c = jnp.zeros((B, H), jnp.float32)
    for t in range(T):
        gates = emb[:, t, :] @ params["W_ih"] + h @ params["W_hh"] + params["b"]
        i_g = jax.nn.sigmoid(gates[:, 0 * H:1 * H])
        f_g = jax.nn.sigmoid(gates[:, 1 * H:2 * H])
        g_g = jnp.tanh(gates[:, 2 * H:3 * H])
        o_g = jax.nn.sigmoid(gates[:, 3 * H:4 * H])
        c = f_g * c + i_g * g_g
        h = o_g * jnp.tanh(c)
    return h @ params["W_fc"] + params["b_fc"]


if __name__ == "__main__":
    VOCAB, EMB, HID = 64, 32, 32
    key = jax.random.PRNGKey(0)
    k_param, k_ids1, k_ids2 = jax.random.split(key, 3)
    params = init_params(k_param, VOCAB, EMB, HID)

    # --- case 1: tiny single block / single time chunk (B=2, T=8).
    B, T = 2, 8
    ids1 = jax.random.randint(k_ids1, (B, T), 0, VOCAB, dtype=jnp.int32)
    ref1 = reference_forward(ids1, params)

    out1 = jax.block_until_ready(
        lstm_sentiment_forward(ids1, params, compute_dtype=jnp.float32))
    assert out1.shape == (B, 1)
    assert jnp.allclose(out1, ref1, atol=1e-4, rtol=1e-4), (out1, ref1)

    # default bf16-weight path (v6e/v7x MXU feeds), loose tolerance at T=8.
    out1b = jax.block_until_ready(lstm_sentiment_forward(ids1, params))
    assert out1b.shape == (B, 1)
    assert jnp.allclose(out1b, ref1, atol=5e-2, rtol=5e-2), (out1b, ref1)

    # --- case 2: two batch blocks, two time chunks, masked padded tail step.
    B2, T2 = 20, 65
    ids2 = jax.random.randint(k_ids2, (B2, T2), 0, VOCAB, dtype=jnp.int32)
    ref2 = reference_forward(ids2, params)
    out2 = jax.block_until_ready(
        lstm_sentiment_forward(ids2, params, compute_dtype=jnp.float32))
    assert out2.shape == (B2, 1)
    assert jnp.allclose(out2, ref2, atol=1e-4, rtol=1e-4), (out2, ref2)

    print("KERNEL_OK")
</pallas_src>

<mosaic_0001>
module attributes {stable_mosaic.version = 11 : i64} {
  func.func @lstm_kernel(%arg0: i32, %arg1: i32, %arg2: memref<1x1x64x32xf32, #tpu.memory_space<vmem>>, %arg3: memref<32x512xf32, #tpu.memory_space<vmem>>, %arg4: memref<128x512xf32, #tpu.memory_space<vmem>>, %arg5: memref<1x512xf32, #tpu.memory_space<vmem>>, %arg6: memref<128x128xf32, #tpu.memory_space<vmem>>, %arg7: memref<1x128xf32, #tpu.memory_space<vmem>>, %arg8: memref<8x128xf32, #tpu.memory_space<vmem>>, %arg9: memref<64x512xf32, #tpu.memory_space<vmem>>, %arg10: memref<8x128xf32, #tpu.memory_space<vmem>>, %arg11: memref<8x128xf32, #tpu.memory_space<vmem>>) attributes {dimension_semantics = [#tpu.dimension_semantics<parallel>, #tpu.dimension_semantics<arbitrary>], iteration_bounds = array<i64: 1, 1>, scalar_prefetch = 0 : i64, scratch_operands = 3 : i64, tpu.core_type = #tpu.core_type<tc>, window_params = [{transform_indices = @transform_0, window_bounds = array<i64: 1, 1, 64, 32>}, {pipeline_mode = #tpu.pipeline_mode<synchronous>, transform_indices = @transform_1, window_bounds = array<i64: 32, 512>}, {pipeline_mode = #tpu.pipeline_mode<synchronous>, transform_indices = @transform_2, window_bounds = array<i64: 128, 512>}, {pipeline_mode = #tpu.pipeline_mode<synchronous>, transform_indices = @transform_3, window_bounds = array<i64: 1, 512>}, {pipeline_mode = #tpu.pipeline_mode<synchronous>, transform_indices = @transform_4, window_bounds = array<i64: 128, 128>}, {pipeline_mode = #tpu.pipeline_mode<synchronous>, transform_indices = @transform_5, window_bounds = array<i64: 1, 128>}, {transform_indices = @transform_6, window_bounds = array<i64: 8, 128>}]} {
    %c0_i32 = arith.constant 0 : i32
    %0 = arith.cmpi eq, %arg1, %c0_i32 : i32
    %1 = arith.extui %0 : i1 to i32
    %c0_i32_0 = arith.constant 0 : i32
    %2 = arith.cmpi ne, %1, %c0_i32_0 : i32
    scf.if %2 {
      %cst_71 = arith.constant 0.000000e+00 : f32
      %211 = vector.broadcast %cst_71 : f32 to vector<8x128xf32>
      %c0_72 = arith.constant 0 : index
      %c0_73 = arith.constant 0 : index
      %212 = vector.load %arg10[%c0_72, %c0_73] : memref<8x128xf32, #tpu.memory_space<vmem>>, vector<8x128xf32>
      tpu.vector_store %arg10[%c0_72, %c0_73], %211 {strides = array<i32>} : memref<8x128xf32, #tpu.memory_space<vmem>>, vector<8x128xf32>,
      %cst_74 = arith.constant 0.000000e+00 : f32
      %213 = vector.broadcast %cst_74 : f32 to vector<8x128xf32>
      %c0_75 = arith.constant 0 : index
      %c0_76 = arith.constant 0 : index
      %214 = vector.load %arg11[%c0_75, %c0_76] : memref<8x128xf32, #tpu.memory_space<vmem>>, vector<8x128xf32>
      tpu.vector_store %arg11[%c0_75, %c0_76], %213 {strides = array<i32>} : memref<8x128xf32, #tpu.memory_space<vmem>>, vector<8x128xf32>,
    } else {
    }
    %c0 = arith.constant 0 : index
    %c0_1 = arith.constant 0 : index
    %c0_2 = arith.constant 0 : index
    %c0_3 = arith.constant 0 : index
    %3 = vector.load %arg2[%c0, %c0_1, %c0_2, %c0_3] : memref<1x1x64x32xf32, #tpu.memory_space<vmem>>, vector<1x1x64x32xf32>
    %4 = vector.shape_cast %3 : vector<1x1x64x32xf32> to vector<64x32xf32>
    %c0_4 = arith.constant 0 : index
    %c0_5 = arith.constant 0 : index
    %5 = vector.load %arg3[%c0_4, %c0_5] : memref<32x512xf32, #tpu.memory_space<vmem>>, vector<32x512xf32>
    %cst = arith.constant dense<0.000000e+00> : vector<64x512xf32>
    %6 = tpu.matmul %4, %5, %cst {dimension_numbers = #tpu.dot_dimension_numbers<[1], [0], [0], [1], [0, 0, 1, 1], [], []>} : vector<64x32xf32>, vector<32x512xf32>, vector<64x512xf32> -> vector<64x512xf32>
    %c0_6 = arith.constant 0 : index
    %c0_7 = arith.constant 0 : index
    %7 = vector.load %arg5[%c0_6, %c0_7] : memref<1x512xf32, #tpu.memory_space<vmem>>, vector<1x512xf32>
    %8 = vector.broadcast %7 : vector<1x512xf32> to vector<64x512xf32>
    %9 = arith.addf %6, %8 : vector<64x512xf32>
    %c0_8 = arith.constant 0 : index
    %c0_9 = arith.constant 0 : index
    %10 = vector.load %arg9[%c0_8, %c0_9] : memref<64x512xf32, #tpu.memory_space<vmem>>, vector<64x512xf32>
    tpu.vector_store %arg9[%c0_8, %c0_9], %9 {strides = array<i32>} : memref<64x512xf32, #tpu.memory_space<vmem>>, vector<64x512xf32>,
    %c0_10 = arith.constant 0 : index
    %c0_11 = arith.constant 0 : index
    %11 = vector.load %arg4[%c0_10, %c0_11] : memref<128x512xf32, #tpu.memory_space<vmem>>, vector<128x512xf32>
    %c0_12 = arith.constant 0 : index
    %c0_13 = arith.constant 0 : index
    %12 = vector.load %arg10[%c0_12, %c0_13] : memref<8x128xf32, #tpu.memory_space<vmem>>, vector<8x128xf32>
    %c0_14 = arith.constant 0 : index
    %c0_15 = arith.constant 0 : index
    %13 = vector.load %arg11[%c0_14, %c0_15] : memref<8x128xf32, #tpu.memory_space<vmem>>, vector<8x128xf32>
    %c0_i32_16 = arith.constant 0 : i32
    %c8_i32 = arith.constant 8 : i32
    %14 = arith.muli %c0_i32_16, %c8_i32 : i32
    %15 = tpu.assume_multiple %14, 8 : i32
    %16 = arith.index_cast %15 : i32 to index
    %c0_17 = arith.constant 0 : index
    %17 = vector.load %arg9[%16, %c0_17] : memref<64x512xf32, #tpu.memory_space<vmem>>, vector<8x512xf32>
    %cst_18 = arith.constant dense<0.000000e+00> : vector<8x512xf32>
    %18 = tpu.matmul %12, %11, %cst_18 {dimension_numbers = #tpu.dot_dimension_numbers<[1], [0], [0], [1], [0, 0, 1, 1], [], []>} : vector<8x128xf32>, vector<128x512xf32>, vector<8x512xf32> -> vector<8x512xf32>
    %19 = arith.addf %17, %18 : vector<8x512xf32>
    %20 = vector.extract_strided_slice %19 {offsets = [0, 0], sizes = [8, 384], strides = [1, 1]} : vector<8x512xf32> to vector<8x384xf32>
    %cst_19 = arith.constant 5.000000e-01 : f32
    %21 = vector.broadcast %cst_19 : f32 to vector<8x384xf32>
    %22 = arith.mulf %21, %20 : vector<8x384xf32>
    %23 = math.tanh %22 : vector<8x384xf32>
    %cst_20 = arith.constant 5.000000e-01 : f32
    %24 = vector.broadcast %cst_20 : f32 to vector<8x384xf32>
    %25 = arith.mulf %24, %23 : vector<8x384xf32>
    %cst_21 = arith.constant 5.000000e-01 : f32
    %26 = vector.broadcast %cst_21 : f32 to vector<8x384xf32>
    %27 = arith.addf %25, %26 : vector<8x384xf32>
    %28 = vector.extract_strided_slice %19 {offsets = [0, 384], sizes = [8, 128], strides = [1, 1]} : vector<8x512xf32> to vector<8x128xf32>
    %29 = math.tanh %28 : vector<8x128xf32>
    %30 = vector.extract_strided_slice %27 {offsets = [0, 0], sizes = [8, 128], strides = [1, 1]} : vector<8x384xf32> to vector<8x128xf32>
    %31 = vector.extract_strided_slice %27 {offsets = [0, 128], sizes = [8, 128], strides = [1, 1]} : vector<8x384xf32> to vector<8x128xf32>
    %32 = vector.extract_strided_slice %27 {offsets = [0, 256], sizes = [8, 128], strides = [1, 1]} : vector<8x384xf32> to vector<8x128xf32>
    %33 = arith.mulf %31, %13 : vector<8x128xf32>
    %34 = arith.mulf %30, %29 : vector<8x128xf32>
    %35 = arith.addf %33, %34 : vector<8x128xf32>
    %36 = math.tanh %35 : vector<8x128xf32>
    %37 = arith.mulf %32, %36 : vector<8x128xf32>
    %c1_i32 = arith.constant 1 : i32
    %c8_i32_22 = arith.constant 8 : i32
    %38 = arith.muli %c1_i32, %c8_i32_22 : i32
    %39 = tpu.assume_multiple %38, 8 : i32
    %40 = arith.index_cast %39 : i32 to index
    %c0_23 = arith.constant 0 : index
    %41 = vector.load %arg9[%40, %c0_23] : memref<64x512xf32, #tpu.memory_space<vmem>>, vector<8x512xf32>
    %cst_24 = arith.constant dense<0.000000e+00> : vector<8x512xf32>
    %42 = tpu.matmul %37, %11, %cst_24 {dimension_numbers = #tpu.dot_dimension_numbers<[1], [0], [0], [1], [0, 0, 1, 1], [], []>} : vector<8x128xf32>, vector<128x512xf32>, vector<8x512xf32> -> vector<8x512xf32>
    %43 = arith.addf %41, %42 : vector<8x512xf32>
    %44 = vector.extract_strided_slice %43 {offsets = [0, 0], sizes = [8, 384], strides = [1, 1]} : vector<8x512xf32> to vector<8x384xf32>
    %cst_25 = arith.constant 5.000000e-01 : f32
    %45 = vector.broadcast %cst_25 : f32 to vector<8x384xf32>
    %46 = arith.mulf %45, %44 : vector<8x384xf32>
    %47 = math.tanh %46 : vector<8x384xf32>
    %cst_26 = arith.constant 5.000000e-01 : f32
    %48 = vector.broadcast %cst_26 : f32 to vector<8x384xf32>
    %49 = arith.mulf %48, %47 : vector<8x384xf32>
    %cst_27 = arith.constant 5.000000e-01 : f32
    %50 = vector.broadcast %cst_27 : f32 to vector<8x384xf32>
    %51 = arith.addf %49, %50 : vector<8x384xf32>
    %52 = vector.extract_strided_slice %43 {offsets = [0, 384], sizes = [8, 128], strides = [1, 1]} : vector<8x512xf32> to vector<8x128xf32>
    %53 = math.tanh %52 : vector<8x128xf32>
    %54 = vector.extract_strided_slice %51 {offsets = [0, 0], sizes = [8, 128], strides = [1, 1]} : vector<8x384xf32> to vector<8x128xf32>
    %55 = vector.extract_strided_slice %51 {offsets = [0, 128], sizes = [8, 128], strides = [1, 1]} : vector<8x384xf32> to vector<8x128xf32>
    %56 = vector.extract_strided_slice %51 {offsets = [0, 256], sizes = [8, 128], strides = [1, 1]} : vector<8x384xf32> to vector<8x128xf32>
    %57 = arith.mulf %55, %35 : vector<8x128xf32>
    %58 = arith.mulf %54, %53 : vector<8x128xf32>
    %59 = arith.addf %57, %58 : vector<8x128xf32>
    %60 = math.tanh %59 : vector<8x128xf32>
    %61 = arith.mulf %56, %60 : vector<8x128xf32>
    %c2_i32 = arith.constant 2 : i32
    %c8_i32_28 = arith.constant 8 : i32
    %62 = arith.muli %c2_i32, %c8_i32_28 : i32
    %63 = tpu.assume_multiple %62, 8 : i32
    %64 = arith.index_cast %63 : i32 to index
    %c0_29 = arith.constant 0 : index
    %65 = vector.load %arg9[%64, %c0_29] : memref<64x512xf32, #tpu.memory_space<vmem>>, vector<8x512xf32>
    %cst_30 = arith.constant dense<0.000000e+00> : vector<8x512xf32>
    %66 = tpu.matmul %61, %11, %cst_30 {dimension_numbers = #tpu.dot_dimension_numbers<[1], [0], [0], [1], [0, 0, 1, 1], [], []>} : vector<8x128xf32>, vector<128x512xf32>, vector<8x512xf32> -> vector<8x512xf32>
    %67 = arith.addf %65, %66 : vector<8x512xf32>
    %68 = vector.extract_strided_slice %67 {offsets = [0, 0], sizes = [8, 384], strides = [1, 1]} : vector<8x512xf32> to vector<8x384xf32>
    %cst_31 = arith.constant 5.000000e-01 : f32
    %69 = vector.broadcast %cst_31 : f32 to vector<8x384xf32>
    %70 = arith.mulf %69, %68 : vector<8x384xf32>
    %71 = math.tanh %70 : vector<8x384xf32>
    %cst_32 = arith.constant 5.000000e-01 : f32
    %72 = vector.broadcast %cst_32 : f32 to vector<8x384xf32>
    %73 = arith.mulf %72, %71 : vector<8x384xf32>
    %cst_33 = arith.constant 5.000000e-01 : f32
    %74 = vector.broadcast %cst_33 : f32 to vector<8x384xf32>
    %75 = arith.addf %73, %74 : vector<8x384xf32>
    %76 = vector.extract_strided_slice %67 {offsets = [0, 384], sizes = [8, 128], strides = [1, 1]} : vector<8x512xf32> to vector<8x128xf32>
    %77 = math.tanh %76 : vector<8x128xf32>
    %78 = vector.extract_strided_slice %75 {offsets = [0, 0], sizes = [8, 128], strides = [1, 1]} : vector<8x384xf32> to vector<8x128xf32>
    %79 = vector.extract_strided_slice %75 {offsets = [0, 128], sizes = [8, 128], strides = [1, 1]} : vector<8x384xf32> to vector<8x128xf32>
    %80 = vector.extract_strided_slice %75 {offsets = [0, 256], sizes = [8, 128], strides = [1, 1]} : vector<8x384xf32> to vector<8x128xf32>
    %81 = arith.mulf %79, %59 : vector<8x128xf32>
    %82 = arith.mulf %78, %77 : vector<8x128xf32>
    %83 = arith.addf %81, %82 : vector<8x128xf32>
    %84 = math.tanh %83 : vector<8x128xf32>
    %85 = arith.mulf %80, %84 : vector<8x128xf32>
    %c3_i32 = arith.constant 3 : i32
    %c8_i32_34 = arith.constant 8 : i32
    %86 = arith.muli %c3_i32, %c8_i32_34 : i32
    %87 = tpu.assume_multiple %86, 8 : i32
    %88 = arith.index_cast %87 : i32 to index
    %c0_35 = arith.constant 0 : index
    %89 = vector.load %arg9[%88, %c0_35] : memref<64x512xf32, #tpu.memory_space<vmem>>, vector<8x512xf32>
    %cst_36 = arith.constant dense<0.000000e+00> : vector<8x512xf32>
    %90 = tpu.matmul %85, %11, %cst_36 {dimension_numbers = #tpu.dot_dimension_numbers<[1], [0], [0], [1], [0, 0, 1, 1], [], []>} : vector<8x128xf32>, vector<128x512xf32>, vector<8x512xf32> -> vector<8x512xf32>
    %91 = arith.addf %89, %90 : vector<8x512xf32>
    %92 = vector.extract_strided_slice %91 {offsets = [0, 0], sizes = [8, 384], strides = [1, 1]} : vector<8x512xf32> to vector<8x384xf32>
    %cst_37 = arith.constant 5.000000e-01 : f32
    %93 = vector.broadcast %cst_37 : f32 to vector<8x384xf32>
    %94 = arith.mulf %93, %92 : vector<8x384xf32>
    %95 = math.tanh %94 : vector<8x384xf32>
    %cst_38 = arith.constant 5.000000e-01 : f32
    %96 = vector.broadcast %cst_38 : f32 to vector<8x384xf32>
    %97 = arith.mulf %96, %95 : vector<8x384xf32>
    %cst_39 = arith.constant 5.000000e-01 : f32
    %98 = vector.broadcast %cst_39 : f32 to vector<8x384xf32>
    %99 = arith.addf %97, %98 : vector<8x384xf32>
    %100 = vector.extract_strided_slice %91 {offsets = [0, 384], sizes = [8, 128], strides = [1, 1]} : vector<8x512xf32> to vector<8x128xf32>
    %101 = math.tanh %100 : vector<8x128xf32>
    %102 = vector.extract_strided_slice %99 {offsets = [0, 0], sizes = [8, 128], strides = [1, 1]} : vector<8x384xf32> to vector<8x128xf32>
    %103 = vector.extract_strided_slice %99 {offsets = [0, 128], sizes = [8, 128], strides = [1, 1]} : vector<8x384xf32> to vector<8x128xf32>
    %104 = vector.extract_strided_slice %99 {offsets = [0, 256], sizes = [8, 128], strides = [1, 1]} : vector<8x384xf32> to vector<8x128xf32>
    %105 = arith.mulf %103, %83 : vector<8x128xf32>
    %106 = arith.mulf %102, %101 : vector<8x128xf32>
    %107 = arith.addf %105, %106 : vector<8x128xf32>
    %108 = math.tanh %107 : vector<8x128xf32>
    %109 = arith.mulf %104, %108 : vector<8x128xf32>
    %c4_i32 = arith.constant 4 : i32
    %c8_i32_40 = arith.constant 8 : i32
    %110 = arith.muli %c4_i32, %c8_i32_40 : i32
    %111 = tpu.assume_multiple %110, 8 : i32
    %112 = arith.index_cast %111 : i32 to index
    %c0_41 = arith.constant 0 : index
    %113 = vector.load %arg9[%112, %c0_41] : memref<64x512xf32, #tpu.memory_space<vmem>>, vector<8x512xf32>
    %cst_42 = arith.constant dense<0.000000e+00> : vector<8x512xf32>
    %114 = tpu.matmul %109, %11, %cst_42 {dimension_numbers = #tpu.dot_dimension_numbers<[1], [0], [0], [1], [0, 0, 1, 1], [], []>} : vector<8x128xf32>, vector<128x512xf32>, vector<8x512xf32> -> vector<8x512xf32>
    %115 = arith.addf %113, %114 : vector<8x512xf32>
    %116 = vector.extract_strided_slice %115 {offsets = [0, 0], sizes = [8, 384], strides = [1, 1]} : vector<8x512xf32> to vector<8x384xf32>
    %cst_43 = arith.constant 5.000000e-01 : f32
    %117 = vector.broadcast %cst_43 : f32 to vector<8x384xf32>
    %118 = arith.mulf %117, %116 : vector<8x384xf32>
    %119 = math.tanh %118 : vector<8x384xf32>
    %cst_44 = arith.constant 5.000000e-01 : f32
    %120 = vector.broadcast %cst_44 : f32 to vector<8x384xf32>
    %121 = arith.mulf %120, %119 : vector<8x384xf32>
    %cst_45 = arith.constant 5.000000e-01 : f32
    %122 = vector.broadcast %cst_45 : f32 to vector<8x384xf32>
    %123 = arith.addf %121, %122 : vector<8x384xf32>
    %124 = vector.extract_strided_slice %115 {offsets = [0, 384], sizes = [8, 128], strides = [1, 1]} : vector<8x512xf32> to vector<8x128xf32>
    %125 = math.tanh %124 : vector<8x128xf32>
    %126 = vector.extract_strided_slice %123 {offsets = [0, 0], sizes = [8, 128], strides = [1, 1]} : vector<8x384xf32> to vector<8x128xf32>
    %127 = vector.extract_strided_slice %123 {offsets = [0, 128], sizes = [8, 128], strides = [1, 1]} : vector<8x384xf32> to vector<8x128xf32>
    %128 = vector.extract_strided_slice %123 {offsets = [0, 256], sizes = [8, 128], strides = [1, 1]} : vector<8x384xf32> to vector<8x128xf32>
    %129 = arith.mulf %127, %107 : vector<8x128xf32>
    %130 = arith.mulf %126, %125 : vector<8x128xf32>
    %131 = arith.addf %129, %130 : vector<8x128xf32>
    %132 = math.tanh %131 : vector<8x128xf32>
    %133 = arith.mulf %128, %132 : vector<8x128xf32>
    %c5_i32 = arith.constant 5 : i32
    %c8_i32_46 = arith.constant 8 : i32
    %134 = arith.muli %c5_i32, %c8_i32_46 : i32
    %135 = tpu.assume_multiple %134, 8 : i32
    %136 = arith.index_cast %135 : i32 to index
    %c0_47 = arith.constant 0 : index
    %137 = vector.load %arg9[%136, %c0_47] : memref<64x512xf32, #tpu.memory_space<vmem>>, vector<8x512xf32>
    %cst_48 = arith.constant dense<0.000000e+00> : vector<8x512xf32>
    %138 = tpu.matmul %133, %11, %cst_48 {dimension_numbers = #tpu.dot_dimension_numbers<[1], [0], [0], [1], [0, 0, 1, 1], [], []>} : vector<8x128xf32>, vector<128x512xf32>, vector<8x512xf32> -> vector<8x512xf32>
    %139 = arith.addf %137, %138 : vector<8x512xf32>
    %140 = vector.extract_strided_slice %139 {offsets = [0, 0], sizes = [8, 384], strides = [1, 1]} : vector<8x512xf32> to vector<8x384xf32>
    %cst_49 = arith.constant 5.000000e-01 : f32
    %141 = vector.broadcast %cst_49 : f32 to vector<8x384xf32>
    %142 = arith.mulf %141, %140 : vector<8x384xf32>
    %143 = math.tanh %142 : vector<8x384xf32>
    %cst_50 = arith.constant 5.000000e-01 : f32
    %144 = vector.broadcast %cst_50 : f32 to vector<8x384xf32>
    %145 = arith.mulf %144, %143 : vector<8x384xf32>
    %cst_51 = arith.constant 5.000000e-01 : f32
    %146 = vector.broadcast %cst_51 : f32 to vector<8x384xf32>
    %147 = arith.addf %145, %146 : vector<8x384xf32>
    %148 = vector.extract_strided_slice %139 {offsets = [0, 384], sizes = [8, 128], strides = [1, 1]} : vector<8x512xf32> to vector<8x128xf32>
    %149 = math.tanh %148 : vector<8x128xf32>
    %150 = vector.extract_strided_slice %147 {offsets = [0, 0], sizes = [8, 128], strides = [1, 1]} : vector<8x384xf32> to vector<8x128xf32>
    %151 = vector.extract_strided_slice %147 {offsets = [0, 128], sizes = [8, 128], strides = [1, 1]} : vector<8x384xf32> to vector<8x128xf32>
    %152 = vector.extract_strided_slice %147 {offsets = [0, 256], sizes = [8, 128], strides = [1, 1]} : vector<8x384xf32> to vector<8x128xf32>
    %153 = arith.mulf %151, %131 : vector<8x128xf32>
    %154 = arith.mulf %150, %149 : vector<8x128xf32>
    %155 = arith.addf %153, %154 : vector<8x128xf32>
    %156 = math.tanh %155 : vector<8x128xf32>
    %157 = arith.mulf %152, %156 : vector<8x128xf32>
    %c6_i32 = arith.constant 6 : i32
    %c8_i32_52 = arith.constant 8 : i32
    %158 = arith.muli %c6_i32, %c8_i32_52 : i32
    %159 = tpu.assume_multiple %158, 8 : i32
    %160 = arith.index_cast %159 : i32 to index
    %c0_53 = arith.constant 0 : index
    %161 = vector.load %arg9[%160, %c0_53] : memref<64x512xf32, #tpu.memory_space<vmem>>, vector<8x512xf32>
    %cst_54 = arith.constant dense<0.000000e+00> : vector<8x512xf32>
    %162 = tpu.matmul %157, %11, %cst_54 {dimension_numbers = #tpu.dot_dimension_numbers<[1], [0], [0], [1], [0, 0, 1, 1], [], []>} : vector<8x128xf32>, vector<128x512xf32>, vector<8x512xf32> -> vector<8x512xf32>
    %163 = arith.addf %161, %162 : vector<8x512xf32>
    %164 = vector.extract_strided_slice %163 {offsets = [0, 0], sizes = [8, 384], strides = [1, 1]} : vector<8x512xf32> to vector<8x384xf32>
    %cst_55 = arith.constant 5.000000e-01 : f32
    %165 = vector.broadcast %cst_55 : f32 to vector<8x384xf32>
    %166 = arith.mulf %165, %164 : vector<8x384xf32>
    %167 = math.tanh %166 : vector<8x384xf32>
    %cst_56 = arith.constant 5.000000e-01 : f32
    %168 = vector.broadcast %cst_56 : f32 to vector<8x384xf32>
    %169 = arith.mulf %168, %167 : vector<8x384xf32>
    %cst_57 = arith.constant 5.000000e-01 : f32
    %170 = vector.broadcast %cst_57 : f32 to vector<8x384xf32>
    %171 = arith.addf %169, %170 : vector<8x384xf32>
    %172 = vector.extract_strided_slice %163 {offsets = [0, 384], sizes = [8, 128], strides = [1, 1]} : vector<8x512xf32> to vector<8x128xf32>
    %173 = math.tanh %172 : vector<8x128xf32>
    %174 = vector.extract_strided_slice %171 {offsets = [0, 0], sizes = [8, 128], strides = [1, 1]} : vector<8x384xf32> to vector<8x128xf32>
    %175 = vector.extract_strided_slice %171 {offsets = [0, 128], sizes = [8, 128], strides = [1, 1]} : vector<8x384xf32> to vector<8x128xf32>
    %176 = vector.extract_strided_slice %171 {offsets = [0, 256], sizes = [8, 128], strides = [1, 1]} : vector<8x384xf32> to vector<8x128xf32>
    %177 = arith.mulf %175, %155 : vector<8x128xf32>
    %178 = arith.mulf %174, %173 : vector<8x128xf32>
    %179 = arith.addf %177, %178 : vector<8x128xf32>
    %180 = math.tanh %179 : vector<8x128xf32>
    %181 = arith.mulf %176, %180 : vector<8x128xf32>
    %c7_i32 = arith.constant 7 : i32
    %c8_i32_58 = arith.constant 8 : i32
    %182 = arith.muli %c7_i32, %c8_i32_58 : i32
    %183 = tpu.assume_multiple %182, 8 : i32
    %184 = arith.index_cast %183 : i32 to index
    %c0_59 = arith.constant 0 : index
    %185 = vector.load %arg9[%184, %c0_59] : memref<64x512xf32, #tpu.memory_space<vmem>>, vector<8x512xf32>
    %cst_60 = arith.constant dense<0.000000e+00> : vector<8x512xf32>
    %186 = tpu.matmul %181, %11, %cst_60 {dimension_numbers = #tpu.dot_dimension_numbers<[1], [0], [0], [1], [0, 0, 1, 1], [], []>} : vector<8x128xf32>, vector<128x512xf32>, vector<8x512xf32> -> vector<8x512xf32>
    %187 = arith.addf %185, %186 : vector<8x512xf32>
    %188 = vector.extract_strided_slice %187 {offsets = [0, 0], sizes = [8, 384], strides = [1, 1]} : vector<8x512xf32> to vector<8x384xf32>
    %cst_61 = arith.constant 5.000000e-01 : f32
    %189 = vector.broadcast %cst_61 : f32 to vector<8x384xf32>
    %190 = arith.mulf %189, %188 : vector<8x384xf32>
    %191 = math.tanh %190 : vector<8x384xf32>
    %cst_62 = arith.constant 5.000000e-01 : f32
    %192 = vector.broadcast %cst_62 : f32 to vector<8x384xf32>
    %193 = arith.mulf %192, %191 : vector<8x384xf32>
    %cst_63 = arith.constant 5.000000e-01 : f32
    %194 = vector.broadcast %cst_63 : f32 to vector<8x384xf32>
    %195 = arith.addf %193, %194 : vector<8x384xf32>
    %196 = vector.extract_strided_slice %187 {offsets = [0, 384], sizes = [8, 128], strides = [1, 1]} : vector<8x512xf32> to vector<8x128xf32>
    %197 = math.tanh %196 : vector<8x128xf32>
    %198 = vector.extract_strided_slice %195 {offsets = [0, 0], sizes = [8, 128], strides = [1, 1]} : vector<8x384xf32> to vector<8x128xf32>
    %199 = vector.extract_strided_slice %195 {offsets = [0, 128], sizes = [8, 128], strides = [1, 1]} : vector<8x384xf32> to vector<8x128xf32>
    %200 = vector.extract_strided_slice %195 {offsets = [0, 256], sizes = [8, 128], strides = [1, 1]} : vector<8x384xf32> to vector<8x128xf32>
    %201 = arith.mulf %199, %179 : vector<8x128xf32>
    %202 = arith.mulf %198, %197 : vector<8x128xf32>
    %203 = arith.addf %201, %202 : vector<8x128xf32>
    %204 = math.tanh %203 : vector<8x128xf32>
    %205 = arith.mulf %200, %204 : vector<8x128xf32>
    %c8_i32_64 = arith.constant 8 : i32
    %c0_65 = arith.constant 0 : index
    %c0_66 = arith.constant 0 : index
    %206 = vector.load %arg10[%c0_65, %c0_66] : memref<8x128xf32, #tpu.memory_space<vmem>>, vector<8x128xf32>
    tpu.vector_store %arg10[%c0_65, %c0_66], %205 {strides = array<i32>} : memref<8x128xf32, #tpu.memory_space<vmem>>, vector<8x128xf32>,
    %c0_67 = arith.constant 0 : index
    %c0_68 = arith.constant 0 : index
    %207 = vector.load %arg11[%c0_67, %c0_68] : memref<8x128xf32, #tpu.memory_space<vmem>>, vector<8x128xf32>
    tpu.vector_store %arg11[%c0_67, %c0_68], %203 {strides = array<i32>} : memref<8x128xf32, #tpu.memory_space<vmem>>, vector<8x128xf32>,
    %c0_i32_69 = arith.constant 0 : i32
    %208 = arith.cmpi eq, %arg1, %c0_i32_69 : i32
    %209 = arith.extui %208 : i1 to i32
    %c0_i32_70 = arith.constant 0 : i32
    %210 = arith.cmpi ne, %209, %c0_i32_70 : i32
    scf.if %210 {
      %c0_71 = arith.constant 0 : index
      %c0_72 = arith.constant 0 : index
      %211 = vector.load %arg6[%c0_71, %c0_72] : memref<128x128xf32, #tpu.memory_space<vmem>>, vector<128x128xf32>
      %cst_73 = arith.constant dense<0.000000e+00> : vector<8x128xf32>
      %212 = tpu.matmul %205, %211, %cst_73 {dimension_numbers = #tpu.dot_dimension_numbers<[1], [0], [0], [1], [0, 0, 1, 1], [], []>} : vector<8x128xf32>, vector<128x128xf32>, vector<8x128xf32> -> vector<8x128xf32>
      %c0_74 = arith.constant 0 : index
      %c0_75 = arith.constant 0 : index
      %213 = vector.load %arg7[%c0_74, %c0_75] : memref<1x128xf32, #tpu.memory_space<vmem>>, vector<1x128xf32>
      %214 = vector.broadcast %213 : vector<1x128xf32> to vector<8x128xf32>
      %215 = arith.addf %212, %214 : vector<8x128xf32>
      %c0_76 = arith.constant 0 : index
      %c0_77 = arith.constant 0 : index
      %216 = vector.load %arg8[%c0_76, %c0_77] : memref<8x128xf32, #tpu.memory_space<vmem>>, vector<8x128xf32>
      tpu.vector_store %arg8[%c0_76, %c0_77], %215 {strides = array<i32>} : memref<8x128xf32, #tpu.memory_space<vmem>>, vector<8x128xf32>,
    } else {
    }
    return
  }
  func.func @transform_0(%arg0: i32, %arg1: i32) -> (i32, i32, i32, i32) {
    %c0_i32 = arith.constant 0 : i32
    %c0_i32_0 = arith.constant 0 : i32
    %c0_i32_1 = arith.constant 0 : i32
    return %arg0, %arg1, %c0_i32, %c0_i32_0 : i32, i32, i32, i32
  }
  func.func @transform_1(%arg0: i32, %arg1: i32) -> (i32, i32) {
    %c0_i32 = arith.constant 0 : i32
    %c0_i32_0 = arith.constant 0 : i32
    %c0_i32_1 = arith.constant 0 : i32
    return %c0_i32, %c0_i32_0 : i32, i32
  }
  func.func @transform_2(%arg0: i32, %arg1: i32) -> (i32, i32) {
    %c0_i32 = arith.constant 0 : i32
    %c0_i32_0 = arith.constant 0 : i32
    %c0_i32_1 = arith.constant 0 : i32
    return %c0_i32, %c0_i32_0 : i32, i32
  }
  func.func @transform_3(%arg0: i32, %arg1: i32) -> (i32, i32) {
    %c0_i32 = arith.constant 0 : i32
    %c0_i32_0 = arith.constant 0 : i32
    %c0_i32_1 = arith.constant 0 : i32
    return %c0_i32, %c0_i32_0 : i32, i32
  }
  func.func @transform_4(%arg0: i32, %arg1: i32) -> (i32, i32) {
    %c0_i32 = arith.constant 0 : i32
    %c0_i32_0 = arith.constant 0 : i32
    %c0_i32_1 = arith.constant 0 : i32
    return %c0_i32, %c0_i32_0 : i32, i32
  }
  func.func @transform_5(%arg0: i32, %arg1: i32) -> (i32, i32) {
    %c0_i32 = arith.constant 0 : i32
    %c0_i32_0 = arith.constant 0 : i32
    %c0_i32_1 = arith.constant 0 : i32
    return %c0_i32, %c0_i32_0 : i32, i32
  }
  func.func @transform_6(%arg0: i32, %arg1: i32) -> (i32, i32) {
    %c0_i32 = arith.constant 0 : i32
    %c0_i32_0 = arith.constant 0 : i32
    return %arg0, %c0_i32 : i32, i32
  }
}

</mosaic_0001>

<bundles_post_ra>
// kernel: lstm_sentiment_forward.1
= control target key start
LH: loop header
LB: loop body
LE: loop exit
PB: predicated region body
PF: predicated region fallthrough
CT: control target
= control target key end

     0   :  { %v3653_v3 = vmov 0.0   ;;  %vm75_vm0 = vcmask 261120   ;;  %vm2118_vm1 = vmmov 0   ;;  %s3646_s1 = inlined_call_operand.vmem [shape: f32[32,512], index: 1, kind: input, shape index: {}]   ;;  %s3647_s0 = inlined_call_operand.vmem [shape: f32[1,1,64,32], index: 0, kind: input, shape index: {}]   ;;  %s3648_s2 = inlined_call_operand.vmem [shape: f32[128,512], index: 2, kind: input, shape index: {}]   ;;  %s3649_s3 = inlined_call_operand.vmem [shape: f32[1,512], index: 3, kind: input, shape index: {}]   ;;  %s3650_s4 = inlined_call_operand.vmem [shape: f32[128,128], index: 4, kind: input, shape index: {}]   ;;  %s3651_s5 = inlined_call_operand.vmem [shape: f32[1,128], index: 5, kind: input, shape index: {}]   ;;  %s3652_s6 = inlined_call_operand.vmem [shape: f32[8,128], index: 6, kind: output, shape index: {}]  }
   0x1   :  { %v50_v0 = vld [vmem:[%s3646_s1 + $0x68] sm:$0xff]  ;;  %v52_v1 = vld [vmem:[%s3646_s1 + $0x78] sm:$0xff]  ;;  %v49_v2 = vld [vmem:[%s3646_s1 + $0x60] sm:$0xff]  ;;  %164 = vmatprep.mubr.f32.mxu0 %v3653_v3  ;;  %277 = vmatprep.mubr.f32.mxu1 %v3653_v3 }
   0x2   :  { %124 = vmatprep.subr.mxu0 %v50_v0  ;;  %237 = vmatprep.subr.mxu1 %v52_v1  ;;  %v51_v4 = vld [vmem:[%s3646_s1 + $0x70] sm:$0xff]  ;;  %v46_v5 = vld [vmem:[%s3646_s1 + $0x48] sm:$0xff]  ;;  %v48_v6 = vld [vmem:[%s3646_s1 + $0x58] sm:$0xff] }
   0x3   :  { %125 = vmatpush1.msra.mxu0 %v49_v2  ;;  %238 = vmatpush1.msra.mxu1 %v51_v4  ;;  %v45_v7 = vld [vmem:[%s3646_s1 + $0x40] sm:$0xff]  ;;  %v47_v8 = vld [vmem:[%s3646_s1 + $0x50] sm:$0xff]  ;;  %v42_v9 = vld [vmem:[%s3646_s1 + $0x28] sm:$0xff] }
   0x4   :  { %126 = vmatprep.subr.mxu0 %v46_v5  ;;  %239 = vmatprep.subr.mxu1 %v48_v6  ;;  %v44_v10 = vld [vmem:[%s3646_s1 + $0x38] sm:$0xff]  ;;  %v41_v11 = vld [vmem:[%s3646_s1 + $0x20] sm:$0xff]  ;;  %v43_v12 = vld [vmem:[%s3646_s1 + $0x30] sm:$0xff] }
   0x5   :  { %127 = vmatpush1.msra.mxu0 %v45_v7  ;;  %240 = vmatpush1.msra.mxu1 %v47_v8  ;;  %v38_v13 = vld [vmem:[%s3646_s1 + $0x8] sm:$0xff]  ;;  %v40_v14 = vld [vmem:[%s3646_s1 + $0x18] sm:$0xff]  ;;  %v37_v15 = vld [vmem:[%s3646_s1] sm:$0xff] }
   0x6   :  { %128 = vmatprep.subr.mxu0 %v42_v9  ;;  %241 = vmatprep.subr.mxu1 %v44_v10  ;;  %v39_v16 = vld [vmem:[%s3646_s1 + $0x10] sm:$0xff]  ;;  %v29_v17 = vld [vmem:[%s3647_s0] sm:$0xff]  ;;  %v2210_v18 = vld [vmem:[%s3648_s2 + $0x1e8] sm:$0xff] }
   0x7   :  { %129 = vmatpush1.msra.mxu0 %v41_v11  ;;  %242 = vmatpush1.msra.mxu1 %v43_v12  ;;  %3745 = vst [vmem:[#allocation5_spill] sm:$0xff] %v2210_v18  ;;  %v2215_v19 = vld [vmem:[%s3648_s2 + $0x1f8] sm:$0xff]  ;;  %v2220_v20 = vld [vmem:[%s3648_s2 + $0x1e0] sm:$0xff]  ;;  %v2225_v21 = vld [vmem:[%s3648_s2 + $0x1f0] sm:$0xff] }
   0x8   :  { %130 = vmatprep.subr.mxu0 %v38_v13  ;;  %243 = vmatprep.subr.mxu1 %v40_v14  ;;  %3746 = vst [vmem:[#allocation6_spill] sm:$0xff] %v2215_v19  ;;  %v2232_v22 = vld [vmem:[%s3648_s2 + $0x1c8] sm:$0xff]  ;;  %v2237_v23 = vld [vmem:[%s3648_s2 + $0x1d8] sm:$0xff]  ;;  %v2246_v24 = vld [vmem:[%s3648_s2 + $0x1c0] sm:$0xff] }
   0x9   :  { %131 = vmatpush1.msra.mxu0 %v37_v15  ;;  %244 = vmatpush1.msra.mxu1 %v39_v16  ;;  %v2251_v25 = vld [vmem:[%s3648_s2 + $0x1d0] sm:$0xff]  ;;  %v30_v26 = vld [vmem:[%s3647_s0 + $0x8] sm:$0xff]  ;;  %v2268_v28 = vld [vmem:[%s3648_s2 + $0x1b8] sm:$0xff] }
   0xa   :  { %1902 = vmatmul.mubr.msk.f32.vlgmr.msra.gmra.mxu0 %vm75_vm0, %v29_v17  ;;  %1910 = vmatmul.mubr.msk.f32.vlgmr.msra.gmra.mxu1 %vm75_vm0, %v29_v17  ;;  %v2263_v27 = vld [vmem:[%s3648_s2 + $0x1a8] sm:$0xff]  ;;  %v2275_v29 = vld [vmem:[%s3648_s2 + $0x1a0] sm:$0xff]  ;;  %v2280_v30 = vld [vmem:[%s3648_s2 + $0x1b0] sm:$0xff] }
   0xb   :  { %431 = vmatprep.subr.mxu0 %v2210_v18  ;;  %502 = vmatprep.subr.mxu1 %v2215_v19  ;;  %v2287_v31 = vld [vmem:[%s3648_s2 + $0x188] sm:$0xff]  ;;  %v2292_v32 = vld [vmem:[%s3648_s2 + $0x198] sm:$0xff]  ;;  %v2301_v33 = vld [vmem:[%s3648_s2 + $0x180] sm:$0xff] }
   0xc   :  { %432 = vmatpush1.msra.mxu0 %v2220_v20  ;;  %503 = vmatpush1.msra.mxu1 %v2225_v21  ;;  %v2306_v34 = vld [vmem:[%s3648_s2 + $0x190] sm:$0xff]  ;;  %v2318_v36 = vld [vmem:[%s3648_s2 + $0x168] sm:$0xff]  ;;  %v2323_v37 = vld [vmem:[%s3648_s2 + $0x178] sm:$0xff] }
   0xd   :  { %433 = vmatprep.subr.mxu0 %v2232_v22  ;;  %504 = vmatprep.subr.mxu1 %v2237_v23  ;;  %v31_v35 = vld [vmem:[%s3647_s0 + $0x10] sm:$0xff]  ;;  %v2330_v38 = vld [vmem:[%s3648_s2 + $0x160] sm:$0xff]  ;;  %v2342_v40 = vld [vmem:[%s3648_s2 + $0x148] sm:$0xff] }
   0xe   :  { %170 = vmatprep.mubr.f32.mxu0 %v3653_v3  ;;  %283 = vmatprep.mubr.f32.mxu1 %v3653_v3  ;;  %v2335_v39 = vld [vmem:[%s3648_s2 + $0x170] sm:$0xff]  ;;  %v2347_v41 = vld [vmem:[%s3648_s2 + $0x158] sm:$0xff]  ;;  %v2356_v42 = vld [vmem:[%s3648_s2 + $0x140] sm:$0xff] }
   0xf   :  { %434 = vmatpush1.msra.mxu0 %v2246_v24  ;;  %505 = vmatpush1.msra.mxu1 %v2251_v25  ;;  %v2361_v43 = vld [vmem:[%s3648_s2 + $0x150] sm:$0xff]  ;;  %v32_v44 = vld [vmem:[%s3647_s0 + $0x18] sm:$0xff]  ;;  %v2373_v45 = vld [vmem:[%s3648_s2 + $0x128] sm:$0xff] }
  0x10   :  { %1903 = vmatmul.mubr.msk.f32.gmra.mxu0 %vm75_vm0, %v30_v26  ;;  %1911 = vmatmul.mubr.msk.f32.gmra.mxu1 %vm75_vm0, %v30_v26  ;;  %v2378_v46 = vld [vmem:[%s3648_s2 + $0x138] sm:$0xff]  ;;  %v2385_v47 = vld [vmem:[%s3648_s2 + $0x120] sm:$0xff]  ;;  %v2390_v48 = vld [vmem:[%s3648_s2 + $0x130] sm:$0xff] }
  0x11   :  { %435 = vmatprep.subr.mxu0 %v2263_v27  ;;  %506 = vmatprep.subr.mxu1 %v2268_v28  ;;  %v2397_v49 = vld [vmem:[%s3648_s2 + $0x108] sm:$0xff]  ;;  %v2402_v50 = vld [vmem:[%s3648_s2 + $0x118] sm:$0xff]  ;;  %v2411_v51 = vld [vmem:[%s3648_s2 + $0x100] sm:$0xff] }
  0x12   :  { %436 = vmatpush1.msra.mxu0 %v2275_v29  ;;  %507 = vmatpush1.msra.mxu1 %v2280_v30  ;;  %v2416_v52 = vld [vmem:[%s3648_s2 + $0x110] sm:$0xff]  ;;  %v33_v53 = vld [vmem:[%s3647_s0 + $0x20] sm:$0xff]  ;;  %v2428_v54 = vld [vmem:[%s3648_s2 + $0xe8] sm:$0xff] }
  0x13   :  { %437 = vmatprep.subr.mxu0 %v2287_v31  ;;  %508 = vmatprep.subr.mxu1 %v2292_v32  ;;  %v2433_v55 = vld [vmem:[%s3648_s2 + $0xf8] sm:$0xff]  ;;  %v2440_v56 = vld [vmem:[%s3648_s2 + $0xe0] sm:$0xff]  ;;  %v2445_v57 = vld [vmem:[%s3648_s2 + $0xf0] sm:$0xff] }
  0x14   :  { %176 = vmatprep.mubr.f32.mxu0 %v3653_v3  ;;  %289 = vmatprep.mubr.f32.mxu1 %v3653_v3  ;;  %v2452_v58 = vld [vmem:[%s3648_s2 + $0xc8] sm:$0xff]  ;;  %v2457_v59 = vld [vmem:[%s3648_s2 + $0xd8] sm:$0xff]  ;;  %v2466_v60 = vld [vmem:[%s3648_s2 + $0xc0] sm:$0xff] }
  0x15   :  { %438 = vmatpush1.msra.mxu0 %v2301_v33  ;;  %509 = vmatpush1.msra.mxu1 %v2306_v34  ;;  %v2471_v61 = vld [vmem:[%s3648_s2 + $0xd0] sm:$0xff]  ;;  %v34_v62 = vld [vmem:[%s3647_s0 + $0x28] sm:$0xff]  ;;  %v2488_v0 = vld [vmem:[%s3648_s2 + $0xb8] sm:$0xff] }
  0x16   :  { %1904 = vmatmul.mubr.msk.f32.gmra.mxu0 %vm75_vm0, %v31_v35  ;;  %1912 = vmatmul.mubr.msk.f32.gmra.mxu1 %vm75_vm0, %v31_v35  ;;  %v2483_v63 = vld [vmem:[%s3648_s2 + $0xa8] sm:$0xff]  ;;  %v2495_v1 = vld [vmem:[%s3648_s2 + $0xa0] sm:$0xff]  ;;  %v2500_v2 = vld [vmem:[%s3648_s2 + $0xb0] sm:$0xff] }
  0x17   :  { %439 = vmatprep.subr.mxu0 %v2318_v36  ;;  %510 = vmatprep.subr.mxu1 %v2323_v37  ;;  %3747 = vst [vmem:[#allocation7_spill] sm:$0xff] %v2500_v2  ;;  %v2507_v4 = vld [vmem:[%s3648_s2 + $0x88] sm:$0xff]  ;;  %v2512_v5 = vld [vmem:[%s3648_s2 + $0x98] sm:$0xff]  ;;  %v2521_v6 = vld [vmem:[%s3648_s2 + $0x80] sm:$0xff] }
  0x18   :  { %440 = vmatpush1.msra.mxu0 %v2330_v38  ;;  %511 = vmatpush1.msra.mxu1 %v2335_v39  ;;  %3748 = vst [vmem:[#allocation8_spill] sm:$0xff] %v2507_v4  ;;  %3749 = vst [vmem:[#allocation9_spill] sm:$0xff] %v2512_v5  ;;  %v2526_v7 = vld [vmem:[%s3648_s2 + $0x90] sm:$0xff]  ;;  %v2538_v9 = vld [vmem:[%s3648_s2 + $0x68] sm:$0xff] }
  0x19   :  { %441 = vmatprep.subr.mxu0 %v2342_v40  ;;  %512 = vmatprep.subr.mxu1 %v2347_v41  ;;  %3750 = vst [vmem:[#allocation10_spill] sm:$0xff] %v2521_v6  ;;  %3751 = vst [vmem:[#allocation11_spill] sm:$0xff] %v2526_v7  ;;  %v35_v8 = vld [vmem:[%s3647_s0 + $0x30] sm:$0xff]  ;;  %v2543_v10 = vld [vmem:[%s3648_s2 + $0x78] sm:$0xff] }
  0x1a   :  { %182 = vmatprep.mubr.f32.mxu0 %v3653_v3  ;;  %295 = vmatprep.mubr.f32.mxu1 %v3653_v3  ;;  %3752 = vst [vmem:[#allocation12_spill] sm:$0xff] %v2538_v9  ;;  %3753 = vst [vmem:[#allocation13_spill] sm:$0xff] %v2543_v10  ;;  %v2550_v11 = vld [vmem:[%s3648_s2 + $0x60] sm:$0xff]  ;;  %v2555_v12 = vld [vmem:[%s3648_s2 + $0x70] sm:$0xff] }
  0x1b   :  { %442 = vmatpush1.msra.mxu0 %v2356_v42  ;;  %513 = vmatpush1.msra.mxu1 %v2361_v43  ;;  %3754 = vst [vmem:[#allocation14_spill] sm:$0xff] %v2550_v11  ;;  %3755 = vst [vmem:[#allocation15_spill] sm:$0xff] %v2555_v12  ;;  %v2562_v13 = vld [vmem:[%s3648_s2 + $0x48] sm:$0xff]  ;;  %v2567_v14 = vld [vmem:[%s3648_s2 + $0x58] sm:$0xff] }
  0x1c   :  { %1905 = vmatmul.mubr.msk.f32.gmra.mxu0 %vm75_vm0, %v32_v44  ;;  %1913 = vmatmul.mubr.msk.f32.gmra.mxu1 %vm75_vm0, %v32_v44  ;;  %3756 = vst [vmem:[#allocation16_spill] sm:$0xff] %v2562_v13  ;;  %3757 = vst [vmem:[#allocation17_spill] sm:$0xff] %v2567_v14  ;;  %v2576_v15 = vld [vmem:[%s3648_s2 + $0x40] sm:$0xff]  ;;  %v2581_v16 = vld [vmem:[%s3648_s2 + $0x50] sm:$0xff] }
  0x1d   :  { %443 = vmatprep.subr.mxu0 %v2373_v45  ;;  %514 = vmatprep.subr.mxu1 %v2378_v46  ;;  %3758 = vst [vmem:[#allocation18_spill] sm:$0xff] %v2576_v15  ;;  %3759 = vst [vmem:[#allocation19_spill] sm:$0xff] %v2581_v16  ;;  %v36_v17 = vld [vmem:[%s3647_s0 + $0x38] sm:$0xff]  ;;  %v2593_v26 = vld [vmem:[%s3648_s2 + $0x28] sm:$0xff] }
  0x1e   :  { %444 = vmatpush1.msra.mxu0 %v2385_v47  ;;  %515 = vmatpush1.msra.mxu1 %v2390_v48  ;;  %3760 = vst [vmem:[#allocation20_spill] sm:$0xff] %v2593_v26  ;;  %v2598_v35 = vld [vmem:[%s3648_s2 + $0x38] sm:$0xff]  ;;  %v2605_v44 = vld [vmem:[%s3648_s2 + $0x20] sm:$0xff] }
  0x1f   :  { %445 = vmatprep.subr.mxu0 %v2397_v49  ;;  %516 = vmatprep.subr.mxu1 %v2402_v50  ;;  %3761 = vst [vmem:[#allocation21_spill] sm:$0xff] %v2598_v35  ;;  %3762 = vst [vmem:[#allocation22_spill] sm:$0xff] %v2605_v44 }
  0x20   :  { %188 = vmatprep.mubr.f32.mxu0 %v3653_v3  ;;  %301 = vmatprep.mubr.f32.mxu1 %v3653_v3 }
  0x21   :  { %446 = vmatpush1.msra.mxu0 %v2411_v51  ;;  %517 = vmatpush1.msra.mxu1 %v2416_v52 }
  0x22   :  { %1906 = vmatmul.mubr.msk.f32.gmra.mxu0 %vm75_vm0, %v33_v53  ;;  %1914 = vmatmul.mubr.msk.f32.gmra.mxu1 %vm75_vm0, %v33_v53  ;;  %v2610_v53 = vld [vmem:[%s3648_s2 + $0x30] sm:$0xff] }
  0x23   :  { %447 = vmatprep.subr.mxu0 %v2428_v54  ;;  %518 = vmatprep.subr.mxu1 %v2433_v55  ;;  %3763 = vst [vmem:[#allocation23_spill] sm:$0xff] %v2610_v53 }
  0x24   :  { %448 = vmatpush1.msra.mxu0 %v2440_v56  ;;  %519 = vmatpush1.msra.mxu1 %v2445_v57 }
  0x25   :  { %449 = vmatprep.subr.mxu0 %v2452_v58  ;;  %520 = vmatprep.subr.mxu1 %v2457_v59 }
  0x26   :  { %194 = vmatprep.mubr.f32.mxu0 %v3653_v3  ;;  %307 = vmatprep.mubr.f32.mxu1 %v3653_v3 }
  0x27   :  { %450 = vmatpush1.msra.mxu0 %v2466_v60  ;;  %521 = vmatpush1.msra.mxu1 %v2471_v61 }
  0x28   :  { %1907 = vmatmul.mubr.msk.f32.gmra.mxu0 %vm75_vm0, %v34_v62  ;;  %1915 = vmatmul.mubr.msk.f32.gmra.mxu1 %vm75_vm0, %v34_v62  ;;  %v2617_v62 = vld [vmem:[%s3648_s2 + $0x8] sm:$0xff] }
  0x29   :  { %451 = vmatprep.subr.mxu0 %v2483_v63  ;;  %522 = vmatprep.subr.mxu1 %v2488_v0  ;;  %3764 = vst [vmem:[#allocation24_spill] sm:$0xff] %v2617_v62 }
  0x2a   :  { %452 = vmatpush1.msra.mxu0 %v2495_v1  ;;  %523 = vmatpush1.msra.mxu1 %v2500_v2 }
  0x2b   :  { %453 = vmatprep.subr.mxu0 %v2507_v4  ;;  %524 = vmatprep.subr.mxu1 %v2512_v5 }
  0x2c   :  { %200 = vmatprep.mubr.f32.mxu0 %v3653_v3  ;;  %313 = vmatprep.mubr.f32.mxu1 %v3653_v3 }
  0x2d   :  { %454 = vmatpush1.msra.mxu0 %v2521_v6  ;;  %525 = vmatpush1.msra.mxu1 %v2526_v7 }
  0x2e   :  { %1908 = vmatmul.mubr.msk.f32.gmra.mxu0 %vm75_vm0, %v35_v8  ;;  %1916 = vmatmul.mubr.msk.f32.gmra.mxu1 %vm75_vm0, %v35_v8  ;;  %v2622_v8 = vld [vmem:[%s3648_s2 + $0x18] sm:$0xff] }
  0x2f   :  { %455 = vmatprep.subr.mxu0 %v2538_v9  ;;  %526 = vmatprep.subr.mxu1 %v2543_v10  ;;  %3765 = vst [vmem:[#allocation25_spill] sm:$0xff] %v2622_v8 }
  0x30   :  { %456 = vmatpush1.msra.mxu0 %v2550_v11  ;;  %527 = vmatpush1.msra.mxu1 %v2555_v12 }
  0x31   :  { %457 = vmatprep.subr.mxu0 %v2562_v13  ;;  %528 = vmatprep.subr.mxu1 %v2567_v14 }
  0x32   :  { %206 = vmatprep.mubr.f32.mxu0 %v3653_v3  ;;  %319 = vmatprep.mubr.f32.mxu1 %v3653_v3  ;;  %v2629_v3 = vld [vmem:[%s3648_s2] sm:$0xff] }
  0x33   :  { %458 = vmatpush1.msra.mxu0 %v2576_v15  ;;  %529 = vmatpush1.msra.mxu1 %v2581_v16  ;;  %3766 = vst [vmem:[#allocation26_spill] sm:$0xff] %v2629_v3 }
  0x34   :  { %1909 = vmatmul.mubr.msk.f32.gmra.mxu0 %vm75_vm0, %v36_v17  ;;  %1917 = vmatmul.mubr.msk.f32.gmra.mxu1 %vm75_vm0, %v36_v17  ;;  %v2636_v17 = vld [vmem:[%s3648_s2 + $0x10] sm:$0xff] }
  0x35   :  { %459 = vmatprep.subr.mxu0 %v2593_v26  ;;  %530 = vmatprep.subr.mxu1 %v2598_v35  ;;  %3767 = vst [vmem:[#allocation27_spill] sm:$0xff] %v2636_v17  ;;  %v3768_v35 = vmov 0.0  }
  0x36   :  { %460 = vmatpush1.msra.mxu0 %v2605_v44  ;;  %531 = vmatpush1.msra.mxu1 %v2610_v53 }
  0x37   :  { %461 = vmatprep.subr.mxu0 %v2617_v62  ;;  %532 = vmatprep.subr.mxu1 %v2622_v8 }
  0x38   :  { %462 = vmatpush1.msra.mxu0 %v2629_v3  ;;  %495 = vmatprep.mubr.f32.mxu0 %v3768_v35 }
  0x39   :  { %533 = vmatpush1.msra.mxu1 %v2636_v17  ;;  %566 = vmatprep.mubr.f32.mxu1 %v3768_v35 }
  0x3a   :  { %496 = vmatmul.mubr.f32.vlgmr.msra.gmra.mxu0 %v3768_v35  ;;  %567 = vmatmul.mubr.f32.vlgmr.msra.gmra.mxu1 %v3768_v35 }
  0x3b   :  { %602 = vmatprep.subr.mxu0 %v2210_v18  ;;  %673 = vmatprep.subr.mxu1 %v2215_v19 }
  0x3c   :  { %603 = vmatpush1.msra.mxu0 %v2220_v20  ;;  %674 = vmatpush1.msra.mxu1 %v2225_v21 }
  0x3d   :  { %604 = vmatprep.subr.mxu0 %v2232_v22  ;;  %675 = vmatprep.subr.mxu1 %v2237_v23 }
  0x3e   :  { %605 = vmatpush1.msra.mxu0 %v2246_v24  ;;  %676 = vmatpush1.msra.mxu1 %v2251_v25 }
  0x3f   :  { %606 = vmatprep.subr.mxu0 %v2263_v27  ;;  %677 = vmatprep.subr.mxu1 %v2268_v28 }
  0x40   :  { %607 = vmatpush1.msra.mxu0 %v2275_v29  ;;  %678 = vmatpush1.msra.mxu1 %v2280_v30 }
  0x41   :  { %608 = vmatprep.subr.mxu0 %v2287_v31  ;;  %679 = vmatprep.subr.mxu1 %v2292_v32 }
  0x42   :  { %609 = vmatpush1.msra.mxu0 %v2301_v33  ;;  %680 = vmatpush1.msra.mxu1 %v2306_v34 }
  0x43   :  { %610 = vmatprep.subr.mxu0 %v2318_v36  ;;  %681 = vmatprep.subr.mxu1 %v2323_v37 }
  0x44   :  { %611 = vmatpush1.msra.mxu0 %v2330_v38  ;;  %682 = vmatpush1.msra.mxu1 %v2335_v39 }
  0x45   :  { %612 = vmatprep.subr.mxu0 %v2342_v40  ;;  %683 = vmatprep.subr.mxu1 %v2347_v41 }
  0x46   :  { %613 = vmatpush1.msra.mxu0 %v2356_v42  ;;  %684 = vmatpush1.msra.mxu1 %v2361_v43 }
  0x47   :  { %614 = vmatprep.subr.mxu0 %v2373_v45  ;;  %685 = vmatprep.subr.mxu1 %v2378_v46 }
  0x48   :  { %615 = vmatpush1.msra.mxu0 %v2385_v47  ;;  %686 = vmatpush1.msra.mxu1 %v2390_v48 }
  0x49   :  { %616 = vmatprep.subr.mxu0 %v2397_v49  ;;  %687 = vmatprep.subr.mxu1 %v2402_v50 }
  0x4a   :  { %617 = vmatpush1.msra.mxu0 %v2411_v51  ;;  %688 = vmatpush1.msra.mxu1 %v2416_v52 }
  0x4b   :  { %618 = vmatprep.subr.mxu0 %v2428_v54  ;;  %689 = vmatprep.subr.mxu1 %v2433_v55 }
  0x4c   :  { %619 = vmatpush1.msra.mxu0 %v2440_v56  ;;  %690 = vmatpush1.msra.mxu1 %v2445_v57 }
  0x4d   :  { %620 = vmatprep.subr.mxu0 %v2452_v58  ;;  %691 = vmatprep.subr.mxu1 %v2457_v59 }
  0x4e   :  { %621 = vmatpush1.msra.mxu0 %v2466_v60  ;;  %692 = vmatpush1.msra.mxu1 %v2471_v61 }
  0x4f   :  { %622 = vmatprep.subr.mxu0 %v2483_v63  ;;  %693 = vmatprep.subr.mxu1 %v2488_v0 }
  0x50   :  { %623 = vmatpush1.msra.mxu0 %v2495_v1  ;;  %694 = vmatpush1.msra.mxu1 %v2500_v2 }
  0x51   :  { %624 = vmatprep.subr.mxu0 %v2507_v4  ;;  %695 = vmatprep.subr.mxu1 %v2512_v5 }
  0x52   :  { %625 = vmatpush1.msra.mxu0 %v2521_v6  ;;  %696 = vmatpush1.msra.mxu1 %v2526_v7  ;;  %v3769_v6 = vld [vmem:[#allocation21_spill] sm:$0xff] }
  0x53   :  { %626 = vmatprep.subr.mxu0 %v2538_v9  ;;  %697 = vmatprep.subr.mxu1 %v2543_v10 }
  0x54   :  { %627 = vmatpush1.msra.mxu0 %v2550_v11  ;;  %698 = vmatpush1.msra.mxu1 %v2555_v12 }
  0x55   :  { %628 = vmatprep.subr.mxu0 %v2562_v13  ;;  %699 = vmatprep.subr.mxu1 %v2567_v14 }
  0x56   :  { %629 = vmatpush1.msra.mxu0 %v2576_v15  ;;  %700 = vmatpush1.msra.mxu1 %v2581_v16 }
  0x57   :  { %630 = vmatprep.subr.mxu0 %v2593_v26  ;;  %701 = vmatprep.subr.mxu1 %v3769_v6  ;;  %v55_v6 = vlaneseq }
  0x58   :  { %631 = vmatpush1.msra.mxu0 %v2605_v44  ;;  %702 = vmatpush1.msra.mxu1 %v2610_v53 }
  0x59   :  { %632 = vmatprep.subr.mxu0 %v2617_v62  ;;  %703 = vmatprep.subr.mxu1 %v2622_v8  ;;  %v56_v44 = vshrl.u32 %v55_v6, 7 }
  0x5a   :  { %633 = vmatpush1.msra.mxu0 %v2629_v3  ;;  %666 = vmatprep.mubr.f32.mxu0 %v3768_v35  ;;  %v53_v3 = vld [vmem:[%s3649_s3] sm:$0xf] }
  0x5b   :  { %704 = vmatpush1.msra.mxu1 %v2636_v17  ;;  %737 = vmatprep.mubr.f32.mxu1 %v3768_v35  ;;  %v57_v62 = vsub.s32 0, %v56_v44  ;;  %v65_v8 = vsub.s32 2, %v56_v44  ;;  %v61_v35 = vsub.s32 1, %v56_v44 }
  0x5c   :  { %773 = vmatprep.subr.mxu0 %v2210_v18  ;;  %844 = vmatprep.subr.mxu1 %v2215_v19  ;;  %v69_v18 = vsub.s32 3, %v56_v44 }
  0x5d   :  { %v58_v15 = vrot.slane %v53_v3, %v57_v62  ;;  %v2725_v19 = vrot.slane %v53_v3, %v65_v8  ;;  %v62_v13 = vrot.slane %v53_v3, %v61_v35 }
  0x5e   :  { %v2727_v12 = vrot.slane %v53_v3, %v69_v18 }
  0xca   :  { %v2714_v26 = vpop.f32.mrf.mxu0  ;;  %v2716_v53 = vpop.f32.mrf.mxu1 }
  0xcc   :  { %v2721_v16 = vpop.f32.mrf.mxu0  ;;  %v2723_v17 = vpop.f32.mrf.mxu1 }
  0xd0   :  { %v172_v6 = vpop.f32.mrf.mxu0  ;;  %v285_v14 = vpop.f32.mrf.mxu1 }
  0xd1   :  { %v2729_v11 = vadd.f32 %v172_v6, %v58_v15  ;;  %v2732_v10 = vadd.f32 %v285_v14, %v2725_v19 }
  0xd2   :  { %v174_v9 = vpop.f32.mrf.mxu0  ;;  %v287_v7 = vpop.f32.mrf.mxu1 }
  0xd3   :  { %3770 = vst [vmem:[#allocation28_spill] sm:$0xff] %v2729_v11  ;;  %3771 = vst [vmem:[#allocation29_spill] sm:$0xff] %v2732_v10  ;;  %v2734_v5 = vadd.f32 %v174_v9, %v62_v13  ;;  %v2737_v4 = vadd.f32 %v287_v7, %v2727_v12 }
  0xd5   :  { %3772 = vst [vmem:[#allocation30_spill] sm:$0xff] %v2734_v5  ;;  %3773 = vst [vmem:[#allocation31_spill] sm:$0xff] %v2737_v4 }
  0xd6   :  { %v178_v44 = vpop.f32.mrf.mxu0  ;;  %v291_v62 = vpop.f32.mrf.mxu1 }
  0xd7   :  { %v2739_v8 = vadd.f32 %v178_v44, %v58_v15  ;;  %v2742_v35 = vadd.f32 %v291_v62, %v2725_v19 }
  0xd8   :  { %v180_v3 = vpop.f32.mrf.mxu0  ;;  %v293_v18 = vpop.f32.mrf.mxu1 }
  0xd9   :  { %3774 = vst [vmem:[#allocation32_spill] sm:$0xff] %v2739_v8  ;;  %3775 = vst [vmem:[#allocation33_spill] sm:$0xff] %v2742_v35  ;;  %v2744_v6 = vadd.f32 %v180_v3, %v62_v13  ;;  %v2747_v14 = vadd.f32 %v293_v18, %v2727_v12 }
  0xdb   :  { %3776 = vst [vmem:[#allocation34_spill] sm:$0xff] %v2744_v6  ;;  %3777 = vst [vmem:[#allocation35_spill] sm:$0xff] %v2747_v14 }
  0xdc   :  { %v184_v10 = vpop.f32.mrf.mxu0  ;;  %v297_v9 = vpop.f32.mrf.mxu1 }
  0xdd   :  { %v2749_v5 = vadd.f32 %v184_v10, %v58_v15  ;;  %v2752_v7 = vadd.f32 %v297_v9, %v2725_v19 }
  0xde   :  { %v186_v4 = vpop.f32.mrf.mxu0  ;;  %v299_v44 = vpop.f32.mrf.mxu1 }
  0xdf   :  { %3778 = vst [vmem:[#allocation36_spill] sm:$0xff] %v2749_v5  ;;  %3779 = vst [vmem:[#allocation37_spill] sm:$0xff] %v2752_v7  ;;  %v2754_v8 = vadd.f32 %v186_v4, %v62_v13  ;;  %v2757_v62 = vadd.f32 %v299_v44, %v2727_v12 }
  0xe1   :  { %3780 = vst [vmem:[#allocation38_spill] sm:$0xff] %v2754_v8  ;;  %3781 = vst [vmem:[#allocation39_spill] sm:$0xff] %v2757_v62 }
  0xe2   :  { %v190_v35 = vpop.f32.mrf.mxu0  ;;  %v303_v3 = vpop.f32.mrf.mxu1 }
  0xe3   :  { %v2759_v6 = vadd.f32 %v190_v35, %v58_v15  ;;  %v2762_v18 = vadd.f32 %v303_v3, %v2725_v19 }
  0xe4   :  { %v192_v14 = vpop.f32.mrf.mxu0  ;;  %v305_v10 = vpop.f32.mrf.mxu1 }
  0xe5   :  { %3782 = vst [vmem:[#allocation40_spill] sm:$0xff] %v2759_v6  ;;  %3783 = vst [vmem:[#allocation41_spill] sm:$0xff] %v2762_v18  ;;  %v2764_v5 = vadd.f32 %v192_v14, %v62_v13  ;;  %v2767_v9 = vadd.f32 %v305_v10, %v2727_v12 }
  0xe7   :  { %3784 = vst [vmem:[#allocation42_spill] sm:$0xff] %v2764_v5  ;;  %3785 = vst [vmem:[#allocation43_spill] sm:$0xff] %v2767_v9 }
  0xe8   :  { %v196_v7 = vpop.f32.mrf.mxu0  ;;  %v309_v4 = vpop.f32.mrf.mxu1 }
  0xe9   :  { %v2769_v8 = vadd.f32 %v196_v7, %v58_v15  ;;  %v2772_v44 = vadd.f32 %v309_v4, %v2725_v19 }
  0xea   :  { %v198_v62 = vpop.f32.mrf.mxu0  ;;  %v311_v35 = vpop.f32.mrf.mxu1 }
  0xeb   :  { %3786 = vst [vmem:[#allocation44_spill] sm:$0xff] %v2769_v8  ;;  %3787 = vst [vmem:[#allocation45_spill] sm:$0xff] %v2772_v44  ;;  %v2774_v6 = vadd.f32 %v198_v62, %v62_v13  ;;  %v2777_v3 = vadd.f32 %v311_v35, %v2727_v12 }
  0xed   :  { %3788 = vst [vmem:[#allocation46_spill] sm:$0xff] %v2774_v6  ;;  %3789 = vst [vmem:[#allocation47_spill] sm:$0xff] %v2777_v3 }
  0xee   :  { %v202_v18 = vpop.f32.mrf.mxu0  ;;  %v315_v14 = vpop.f32.mrf.mxu1 }
  0xef   :  { %v2779_v5 = vadd.f32 %v202_v18, %v58_v15  ;;  %v2782_v10 = vadd.f32 %v315_v14, %v2725_v19 }
  0xf0   :  { %v204_v9 = vpop.f32.mrf.mxu0  ;;  %v317_v7 = vpop.f32.mrf.mxu1 }
  0xf1   :  { %3790 = vst [vmem:[#allocation48_spill] sm:$0xff] %v2779_v5  ;;  %3791 = vst [vmem:[#allocation49_spill] sm:$0xff] %v2782_v10  ;;  %v2784_v8 = vadd.f32 %v204_v9, %v62_v13  ;;  %v2787_v4 = vadd.f32 %v317_v7, %v2727_v12  ;;  %v167_v9 = vadd.f32 %v2714_v26, %v58_v15 }
  0xf2   :  { %v169_v7 = vadd.f32 %v2721_v16, %v62_v13 }
  0xf3   :  { %3792 = vst [vmem:[#allocation50_spill] sm:$0xff] %v2784_v8  ;;  %3793 = vst [vmem:[#allocation51_spill] sm:$0xff] %v2787_v4 }
  0xf4   :  { %v208_v44 = vpop.f32.mrf.mxu0  ;;  %v321_v62 = vpop.f32.mrf.mxu1 }
  0xf5   :  { %v2789_v6 = vadd.f32 %v208_v44, %v58_v15  ;;  %v2792_v35 = vadd.f32 %v321_v62, %v2725_v19  ;;  %v282_v62 = vadd.f32 %v2723_v17, %v2727_v12 }
  0xf6   :  { %v210_v3 = vpop.f32.mrf.mxu0  ;;  %v323_v18 = vpop.f32.mrf.mxu1 }
  0xf7   :  { %3794 = vst [vmem:[#allocation52_spill] sm:$0xff] %v2789_v6  ;;  %3795 = vst [vmem:[#allocation53_spill] sm:$0xff] %v2792_v35  ;;  %v2794_v5 = vadd.f32 %v210_v3, %v62_v13  ;;  %v2797_v14 = vadd.f32 %v323_v18, %v2727_v12  ;;  %v280_v18 = vadd.f32 %v2716_v53, %v2725_v19 }
  0xf9   :  { %3796 = vst [vmem:[#allocation54_spill] sm:$0xff] %v2794_v5  ;;  %3797 = vst [vmem:[#allocation55_spill] sm:$0xff] %v2797_v14  ;;  %v3819_v5 = vld [vmem:[#allocation27_spill] sm:$0xff] }
  0xfa   :  { %v497_v10 = vpop.f32.mrf.mxu0  ;;  %v568_v8 = vpop.f32.mrf.mxu1 }
  0xfb   :  { %v573_v4 = vadd.f32 %v497_v10, %v167_v9  ;;  %v575_v15 = vadd.f32 %v568_v8, %v280_v18  ;;  %v3803_v18 = vld [vmem:[#allocation12_spill] sm:$0xff] }
  0xfc   :  { %v499_v11 = vpop.f32.mrf.mxu0  ;;  %v570_v2 = vpop.f32.mrf.mxu1 }
  0xfd   :  { %v577_v44 = vmul.f32 0.5, %v573_v4  ;;  %v574_v6 = vadd.f32 %v499_v11, %v169_v7  ;;  %v576_v35 = vadd.f32 %v570_v2, %v282_v62  ;;  %v579_v26 = vmul.f32 0.5, %v575_v15  ;;  %v3801_v62 = vld [vmem:[#allocation10_spill] sm:$0xff]  ;;  %v3804_v15 = vld [vmem:[#allocation13_spill] sm:$0xff] }
  0xff   :  { %1973 = vtanh.f32 %v577_v44  ;;  %v578_v3 = vmul.f32 0.5, %v574_v6  ;;  %v3800_v44 = vld [vmem:[#allocation9_spill] sm:$0xff] }
 0x101   :  { %1975 = vtanh.f32 %v578_v3  ;;  %v3802_v3 = vld [vmem:[#allocation11_spill] sm:$0xff] }
 0x102   :  { %1977 = vtanh.f32 %v576_v35  ;;  %v3798_v35 = vld [vmem:[#allocation7_spill] sm:$0xff] }
 0x103   :  { %1979 = vtanh.f32 %v579_v26  ;;  %v3805_v26 = vld [vmem:[#allocation14_spill] sm:$0xff] }
 0x10c   :  { %v1974_v14 = vpop.eup %1973 }
 0x10d   :  { %v583_v13 = vmul.f32 0.5, %v1974_v14  ;;  %v3799_v14 = vld [vmem:[#allocation8_spill] sm:$0xff] }
 0x10e   :  { %v1976_v16 = vpop.eup %1975 }
 0x10f   :  { %v586_v10 = vadd.f32 0.5, %v583_v13  ;;  %v584_v11 = vmul.f32 0.5, %v1976_v16  ;;  %v1978_v9 = vpop.eup %1977  ;;  %v3806_v13 = vld [vmem:[#allocation15_spill] sm:$0xff]  ;;  %v3807_v16 = vld [vmem:[#allocation16_spill] sm:$0xff] }
 0x110   :  { %v1980_v2 = vpop.eup %1979 }
 0x111   :  { %v587_v4 = vadd.f32 0.5, %v584_v11  ;;  %v591_v12 = vmul.f32 %v1978_v9, %v586_v10  ;;  %v585_v6 = vmul.f32 0.5, %v1980_v2  ;;  %v3808_v10 = vld [vmem:[#allocation17_spill] sm:$0xff]  ;;  %v3809_v11 = vld [vmem:[#allocation18_spill] sm:$0xff]  ;;  %v3811_v9 = vld [vmem:[#allocation20_spill] sm:$0xff] }
 0x112   :  { %v3814_v2 = vld [vmem:[#allocation23_spill] sm:$0xff] }
 0x113   :  { %v590_v7 = vmul.f32 0.0, %v587_v4  ;;  %v588_v19 = vadd.f32 0.5, %v585_v6  ;;  %v3810_v4 = vld [vmem:[#allocation19_spill] sm:$0xff]  ;;  %v3815_v6 = vld [vmem:[#allocation24_spill] sm:$0xff] }
 0x115   :  { %v2805_v17 = vadd.f32 %v591_v12, %v590_v7  ;;  %v3812_v7 = vld [vmem:[#allocation21_spill] sm:$0xff]  ;;  %v3813_v12 = vld [vmem:[#allocation22_spill] sm:$0xff] }
 0x117   :  { %1981 = vtanh.f32 %v2805_v17 }
 0x124   :  { %v1982_v53 = vpop.eup %1981 }
 0x125   :  { %v594_v8 = vmul.f32 %v1982_v53, %v588_v19  ;;  %v3816_v19 = vld [vmem:[#allocation25_spill] sm:$0xff]  ;;  %v3817_v53 = vld [vmem:[#allocation26_spill] sm:$0xff] }
 0x127   :  { %667 = vmatmul.mubr.f32.vlgmr.msra.gmra.mxu0 %v594_v8  ;;  %738 = vmatmul.mubr.f32.vlgmr.msra.gmra.mxu1 %v594_v8  ;;  %v3818_v8 = vmov 0.0  }
 0x128   :  { %774 = vmatpush1.msra.mxu0 %v2220_v20  ;;  %845 = vmatpush1.msra.mxu1 %v2225_v21 }
 0x129   :  { %775 = vmatprep.subr.mxu0 %v2232_v22  ;;  %846 = vmatprep.subr.mxu1 %v2237_v23 }
 0x12a   :  { %776 = vmatpush1.msra.mxu0 %v2246_v24  ;;  %847 = vmatpush1.msra.mxu1 %v2251_v25 }
 0x12b   :  { %777 = vmatprep.subr.mxu0 %v2263_v27  ;;  %848 = vmatprep.subr.mxu1 %v2268_v28 }
 0x12c   :  { %778 = vmatpush1.msra.mxu0 %v2275_v29  ;;  %849 = vmatpush1.msra.mxu1 %v2280_v30 }
 0x12d   :  { %779 = vmatprep.subr.mxu0 %v2287_v31  ;;  %850 = vmatprep.subr.mxu1 %v2292_v32 }
 0x12e   :  { %780 = vmatpush1.msra.mxu0 %v2301_v33  ;;  %851 = vmatpush1.msra.mxu1 %v2306_v34 }
 0x12f   :  { %781 = vmatprep.subr.mxu0 %v2318_v36  ;;  %852 = vmatprep.subr.mxu1 %v2323_v37 }
 0x130   :  { %782 = vmatpush1.msra.mxu0 %v2330_v38  ;;  %853 = vmatpush1.msra.mxu1 %v2335_v39 }
 0x131   :  { %783 = vmatprep.subr.mxu0 %v2342_v40  ;;  %854 = vmatprep.subr.mxu1 %v2347_v41 }
 0x132   :  { %784 = vmatpush1.msra.mxu0 %v2356_v42  ;;  %855 = vmatpush1.msra.mxu1 %v2361_v43 }
 0x133   :  { %785 = vmatprep.subr.mxu0 %v2373_v45  ;;  %856 = vmatprep.subr.mxu1 %v2378_v46 }
 0x134   :  { %786 = vmatpush1.msra.mxu0 %v2385_v47  ;;  %857 = vmatpush1.msra.mxu1 %v2390_v48 }
 0x135   :  { %787 = vmatprep.subr.mxu0 %v2397_v49  ;;  %858 = vmatprep.subr.mxu1 %v2402_v50 }
 0x136   :  { %788 = vmatpush1.msra.mxu0 %v2411_v51  ;;  %859 = vmatpush1.msra.mxu1 %v2416_v52 }
 0x137   :  { %789 = vmatprep.subr.mxu0 %v2428_v54  ;;  %860 = vmatprep.subr.mxu1 %v2433_v55 }
 0x138   :  { %790 = vmatpush1.msra.mxu0 %v2440_v56  ;;  %861 = vmatpush1.msra.mxu1 %v2445_v57 }
 0x139   :  { %791 = vmatprep.subr.mxu0 %v2452_v58  ;;  %862 = vmatprep.subr.mxu1 %v2457_v59 }
 0x13a   :  { %792 = vmatpush1.msra.mxu0 %v2466_v60  ;;  %863 = vmatpush1.msra.mxu1 %v2471_v61 }
 0x13b   :  { %793 = vmatprep.subr.mxu0 %v2483_v63  ;;  %864 = vmatprep.subr.mxu1 %v2488_v0 }
 0x13c   :  { %794 = vmatpush1.msra.mxu0 %v2495_v1  ;;  %865 = vmatpush1.msra.mxu1 %v3798_v35 }
 0x13d   :  { %795 = vmatprep.subr.mxu0 %v3799_v14  ;;  %866 = vmatprep.subr.mxu1 %v3800_v44 }
 0x13e   :  { %796 = vmatpush1.msra.mxu0 %v3801_v62  ;;  %867 = vmatpush1.msra.mxu1 %v3802_v3 }
 0x13f   :  { %797 = vmatprep.subr.mxu0 %v3803_v18  ;;  %868 = vmatprep.subr.mxu1 %v3804_v15 }
 0x140   :  { %798 = vmatpush1.msra.mxu0 %v3805_v26  ;;  %869 = vmatpush1.msra.mxu1 %v3806_v13  ;;  %v3824_v26 = vld [vmem:[#allocation31_spill] sm:$0xff] }
 0x141   :  { %799 = vmatprep.subr.mxu0 %v3807_v16  ;;  %870 = vmatprep.subr.mxu1 %v3808_v10 }
 0x142   :  { %800 = vmatpush1.msra.mxu0 %v3809_v11  ;;  %871 = vmatpush1.msra.mxu1 %v3810_v4  ;;  %v3820_v4 = vld [vmem:[#allocation5_spill] sm:$0xff]  ;;  %v3822_v11 = vld [vmem:[#allocation28_spill] sm:$0xff] }
 0x143   :  { %801 = vmatprep.subr.mxu0 %v3811_v9  ;;  %872 = vmatprep.subr.mxu1 %v3812_v7  ;;  %v3821_v9 = vld [vmem:[#allocation6_spill] sm:$0xff] }
 0x144   :  { %802 = vmatpush1.msra.mxu0 %v3813_v12  ;;  %873 = vmatpush1.msra.mxu1 %v3814_v2 }
 0x145   :  { %803 = vmatprep.subr.mxu0 %v3815_v6  ;;  %874 = vmatprep.subr.mxu1 %v3816_v19  ;;  %v3823_v19 = vld [vmem:[#allocation30_spill] sm:$0xff] }
 0x146   :  { %804 = vmatpush1.msra.mxu0 %v3817_v53  ;;  %837 = vmatprep.mubr.f32.mxu0 %v3818_v8 }
 0x147   :  { %875 = vmatpush1.msra.mxu1 %v3819_v5  ;;  %908 = vmatprep.mubr.f32.mxu1 %v3818_v8  ;;  %v3825_v5 = vld [vmem:[#allocation29_spill] sm:$0xff] }
 0x148   :  { %944 = vmatprep.subr.mxu0 %v3820_v4  ;;  %1015 = vmatprep.subr.mxu1 %v3821_v9 }
 0x1e7   :  { %v668_v7 = vpop.f32.mrf.mxu0  ;;  %v739_v12 = vpop.f32.mrf.mxu1 }
 0x1e8   :  { %v744_v2 = vadd.f32 %v668_v7, %v3822_v11  ;;  %v746_v8 = vadd.f32 %v739_v12, %v3825_v5 }
 0x1e9   :  { %v670_v10 = vpop.f32.mrf.mxu0  ;;  %v741_v6 = vpop.f32.mrf.mxu1 }
 0x1ea   :  { %v748_v16 = vmul.f32 0.5, %v744_v2  ;;  %v745_v13 = vadd.f32 %v670_v10, %v3823_v19  ;;  %v747_v15 = vadd.f32 %v741_v6, %v3824_v26  ;;  %v750_v4 = vmul.f32 0.5, %v746_v8 }
 0x1ec   :  { %1983 = vtanh.f32 %v748_v16  ;;  %v749_v53 = vmul.f32 0.5, %v745_v13 }
 0x1ee   :  { %1985 = vtanh.f32 %v749_v53  ;;  %v3849_v53 = vld [vmem:[#allocation34_spill] sm:$0xff] }
 0x1ef   :  { %1987 = vtanh.f32 %v747_v15 }
 0x1f0   :  { %1989 = vtanh.f32 %v750_v4 }
 0x1f9   :  { %v1984_v18 = vpop.eup %1983 }
 0x1fa   :  { %v754_v9 = vmul.f32 0.5, %v1984_v18  ;;  %v3848_v18 = vld [vmem:[#allocation32_spill] sm:$0xff] }
 0x1fb   :  { %v1986_v3 = vpop.eup %1985 }
 0x1fc   :  { %v757_v62 = vadd.f32 0.5, %v754_v9  ;;  %v755_v11 = vmul.f32 0.5, %v1986_v3  ;;  %v1988_v7 = vpop.eup %1987 }
 0x1fd   :  { %v1990_v26 = vpop.eup %1989 }
 0x1fe   :  { %v758_v44 = vadd.f32 0.5, %v755_v11  ;;  %v762_v2 = vmul.f32 %v1988_v7, %v757_v62  ;;  %v756_v15 = vmul.f32 0.5, %v1990_v26  ;;  %v3850_v7 = vld [vmem:[#allocation35_spill] sm:$0xff] }
 0x200   :  { %v761_v10 = vmul.f32 %v758_v44, %v2805_v17  ;;  %v759_v13 = vadd.f32 0.5, %v756_v15  ;;  %v3846_v17 = vld [vmem:[#allocation5_spill] sm:$0xff]  ;;  %v3847_v44 = vld [vmem:[#allocation6_spill] sm:$0xff] }
 0x202   :  { %v2879_v16 = vadd.f32 %v762_v2, %v761_v10  ;;  %v3851_v10 = vld [vmem:[#allocation33_spill] sm:$0xff] }
 0x204   :  { %1991 = vtanh.f32 %v2879_v16 }
 0x211   :  { %v1992_v5 = vpop.eup %1991 }
 0x212   :  { %v765_v12 = vmul.f32 %v1992_v5, %v759_v13 }
 0x214   :  { %838 = vmatmul.mubr.f32.vlgmr.msra.gmra.mxu0 %v765_v12  ;;  %909 = vmatmul.mubr.f32.vlgmr.msra.gmra.mxu1 %v765_v12 }
 0x215   :  { %945 = vmatpush1.msra.mxu0 %v2220_v20  ;;  %1016 = vmatpush1.msra.mxu1 %v2225_v21  ;;  %v3826_v20 = vld [vmem:[#allocation9_spill] sm:$0xff]  ;;  %v3827_v21 = vld [vmem:[#allocation10_spill] sm:$0xff] }
 0x216   :  { %946 = vmatprep.subr.mxu0 %v2232_v22  ;;  %1017 = vmatprep.subr.mxu1 %v2237_v23  ;;  %v3828_v22 = vld [vmem:[#allocation11_spill] sm:$0xff]  ;;  %v3829_v23 = vld [vmem:[#allocation12_spill] sm:$0xff] }
 0x217   :  { %947 = vmatpush1.msra.mxu0 %v2246_v24  ;;  %1018 = vmatpush1.msra.mxu1 %v2251_v25  ;;  %v3830_v24 = vld [vmem:[#allocation13_spill] sm:$0xff]  ;;  %v3831_v25 = vld [vmem:[#allocation14_spill] sm:$0xff] }
 0x218   :  { %948 = vmatprep.subr.mxu0 %v2263_v27  ;;  %1019 = vmatprep.subr.mxu1 %v2268_v28  ;;  %v3832_v27 = vld [vmem:[#allocation15_spill] sm:$0xff]  ;;  %v3833_v28 = vld [vmem:[#allocation16_spill] sm:$0xff] }
 0x219   :  { %949 = vmatpush1.msra.mxu0 %v2275_v29  ;;  %1020 = vmatpush1.msra.mxu1 %v2280_v30  ;;  %v3834_v29 = vld [vmem:[#allocation17_spill] sm:$0xff]  ;;  %v3835_v30 = vld [vmem:[#allocation18_spill] sm:$0xff] }
 0x21a   :  { %950 = vmatprep.subr.mxu0 %v2287_v31  ;;  %1021 = vmatprep.subr.mxu1 %v2292_v32  ;;  %v3836_v31 = vld [vmem:[#allocation19_spill] sm:$0xff]  ;;  %v3837_v32 = vld [vmem:[#allocation20_spill] sm:$0xff] }
 0x21b   :  { %951 = vmatpush1.msra.mxu0 %v2301_v33  ;;  %1022 = vmatpush1.msra.mxu1 %v2306_v34  ;;  %v3838_v33 = vld [vmem:[#allocation21_spill] sm:$0xff]  ;;  %v3839_v34 = vld [vmem:[#allocation22_spill] sm:$0xff] }
 0x21c   :  { %952 = vmatprep.subr.mxu0 %v2318_v36  ;;  %1023 = vmatprep.subr.mxu1 %v2323_v37  ;;  %v3840_v36 = vld [vmem:[#allocation23_spill] sm:$0xff]  ;;  %v3841_v37 = vld [vmem:[#allocation24_spill] sm:$0xff] }
 0x21d   :  { %953 = vmatpush1.msra.mxu0 %v2330_v38  ;;  %1024 = vmatpush1.msra.mxu1 %v2335_v39  ;;  %v3842_v38 = vld [vmem:[#allocation25_spill] sm:$0xff]  ;;  %v3843_v39 = vld [vmem:[#allocation26_spill] sm:$0xff] }
 0x21e   :  { %954 = vmatprep.subr.mxu0 %v2342_v40  ;;  %1025 = vmatprep.subr.mxu1 %v2347_v41  ;;  %v3844_v40 = vmov 0.0   ;;  %v3845_v41 = vld [vmem:[#allocation27_spill] sm:$0xff] }
 0x21f   :  { %955 = vmatpush1.msra.mxu0 %v2356_v42  ;;  %1026 = vmatpush1.msra.mxu1 %v2361_v43 }
 0x220   :  { %956 = vmatprep.subr.mxu0 %v2373_v45  ;;  %1027 = vmatprep.subr.mxu1 %v2378_v46 }
 0x221   :  { %957 = vmatpush1.msra.mxu0 %v2385_v47  ;;  %1028 = vmatpush1.msra.mxu1 %v2390_v48 }
 0x222   :  { %958 = vmatprep.subr.mxu0 %v2397_v49  ;;  %1029 = vmatprep.subr.mxu1 %v2402_v50 }
 0x223   :  { %959 = vmatpush1.msra.mxu0 %v2411_v51  ;;  %1030 = vmatpush1.msra.mxu1 %v2416_v52 }
 0x224   :  { %960 = vmatprep.subr.mxu0 %v2428_v54  ;;  %1031 = vmatprep.subr.mxu1 %v2433_v55 }
 0x225   :  { %961 = vmatpush1.msra.mxu0 %v2440_v56  ;;  %1032 = vmatpush1.msra.mxu1 %v2445_v57 }
 0x226   :  { %962 = vmatprep.subr.mxu0 %v2452_v58  ;;  %1033 = vmatprep.subr.mxu1 %v2457_v59 }
 0x227   :  { %963 = vmatpush1.msra.mxu0 %v2466_v60  ;;  %1034 = vmatpush1.msra.mxu1 %v2471_v61 }
 0x228   :  { %964 = vmatprep.subr.mxu0 %v2483_v63  ;;  %1035 = vmatprep.subr.mxu1 %v2488_v0 }
 0x229   :  { %965 = vmatpush1.msra.mxu0 %v2495_v1  ;;  %1036 = vmatpush1.msra.mxu1 %v3798_v35 }
 0x22a   :  { %966 = vmatprep.subr.mxu0 %v3799_v14  ;;  %1037 = vmatprep.subr.mxu1 %v3826_v20 }
 0x22b   :  { %967 = vmatpush1.msra.mxu0 %v3827_v21  ;;  %1038 = vmatpush1.msra.mxu1 %v3828_v22 }
 0x22c   :  { %968 = vmatprep.subr.mxu0 %v3829_v23  ;;  %1039 = vmatprep.subr.mxu1 %v3830_v24 }
 0x22d   :  { %969 = vmatpush1.msra.mxu0 %v3831_v25  ;;  %1040 = vmatpush1.msra.mxu1 %v3832_v27 }
 0x22e   :  { %970 = vmatprep.subr.mxu0 %v3833_v28  ;;  %1041 = vmatprep.subr.mxu1 %v3834_v29 }
 0x22f   :  { %971 = vmatpush1.msra.mxu0 %v3835_v30  ;;  %1042 = vmatpush1.msra.mxu1 %v3836_v31 }
 0x230   :  { %972 = vmatprep.subr.mxu0 %v3837_v32  ;;  %1043 = vmatprep.subr.mxu1 %v3838_v33 }
 0x231   :  { %973 = vmatpush1.msra.mxu0 %v3839_v34  ;;  %1044 = vmatpush1.msra.mxu1 %v3840_v36 }
 0x232   :  { %974 = vmatprep.subr.mxu0 %v3841_v37  ;;  %1045 = vmatprep.subr.mxu1 %v3842_v38 }
 0x233   :  { %975 = vmatpush1.msra.mxu0 %v3843_v39  ;;  %1008 = vmatprep.mubr.f32.mxu0 %v3844_v40 }
 0x234   :  { %1046 = vmatpush1.msra.mxu1 %v3845_v41  ;;  %1079 = vmatprep.mubr.f32.mxu1 %v3844_v40 }
 0x235   :  { %1115 = vmatprep.subr.mxu0 %v3846_v17  ;;  %1186 = vmatprep.subr.mxu1 %v3847_v44 }
 0x2d4   :  { %v839_v62 = vpop.f32.mrf.mxu0  ;;  %v910_v3 = vpop.f32.mrf.mxu1 }
 0x2d5   :  { %v915_v4 = vadd.f32 %v839_v62, %v3848_v18  ;;  %v917_v26 = vadd.f32 %v910_v3, %v3851_v10  ;;  %v2977_v10 = vld [vmem:[%s3648_s2 + $0x1d8] sm:$0xff] }
 0x2d6   :  { %v841_v9 = vpop.f32.mrf.mxu0  ;;  %v912_v6 = vpop.f32.mrf.mxu1 }
 0x2d7   :  { %v919_v19 = vmul.f32 0.5, %v915_v4  ;;  %v916_v8 = vadd.f32 %v841_v9, %v3849_v53  ;;  %v918_v2 = vadd.f32 %v912_v6, %v3850_v7  ;;  %v921_v15 = vmul.f32 0.5, %v917_v26  ;;  %v2959_v7 = vld [vmem:[%s3648_s2 + $0x1e0] sm:$0xff] }
 0x2d8   :  { %v2983_v26 = vld [vmem:[%s3648_s2 + $0x1c0] sm:$0xff] }
 0x2d9   :  { %1993 = vtanh.f32 %v919_v19  ;;  %v920_v11 = vmul.f32 0.5, %v916_v8 }
 0x2db   :  { %1995 = vtanh.f32 %v920_v11 }
 0x2dc   :  { %1997 = vtanh.f32 %v918_v2  ;;  %v2971_v2 = vld [vmem:[%s3648_s2 + $0x1c8] sm:$0xff] }
 0x2dd   :  { %1999 = vtanh.f32 %v921_v15  ;;  %v2989_v15 = vld [vmem:[%s3648_s2 + $0x1d0] sm:$0xff] }
 0x2e6   :  { %v1994_v13 = vpop.eup %1993 }
 0x2e7   :  { %v925_v5 = vmul.f32 0.5, %v1994_v13  ;;  %v2995_v13 = vld [vmem:[%s3648_s2 + $0x1a8] sm:$0xff] }
 0x2e8   :  { %v1996_v12 = vpop.eup %1995 }
 0x2e9   :  { %v928_v17 = vadd.f32 0.5, %v925_v5  ;;  %v926_v44 = vmul.f32 0.5, %v1996_v12  ;;  %v1998_v62 = vpop.eup %1997  ;;  %v3001_v5 = vld [vmem:[%s3648_s2 + $0x1b8] sm:$0xff]  ;;  %v3007_v12 = vld [vmem:[%s3648_s2 + $0x1a0] sm:$0xff] }
 0x2ea   :  { %v2000_v6 = vpop.eup %1999 }
 0x2eb   :  { %v929_v18 = vadd.f32 0.5, %v926_v44  ;;  %v933_v4 = vmul.f32 %v1998_v62, %v928_v17  ;;  %v927_v53 = vmul.f32 0.5, %v2000_v6  ;;  %v3013_v17 = vld [vmem:[%s3648_s2 + $0x1b0] sm:$0xff]  ;;  %v3019_v44 = vld [vmem:[%s3648_s2 + $0x188] sm:$0xff]  ;;  %v3025_v62 = vld [vmem:[%s3648_s2 + $0x198] sm:$0xff] }
 0x2ec   :  { %v3049_v6 = vld [vmem:[%s3648_s2 + $0x178] sm:$0xff] }
 0x2ed   :  { %v932_v9 = vmul.f32 %v929_v18, %v2879_v16  ;;  %v930_v8 = vadd.f32 0.5, %v927_v53  ;;  %v2965_v16 = vld [vmem:[%s3648_s2 + $0x1f0] sm:$0xff]  ;;  %v3031_v18 = vld [vmem:[%s3648_s2 + $0x180] sm:$0xff] }
 0x2ee   :  { %v3055_v53 = vld [vmem:[%s3648_s2 + $0x160] sm:$0xff] }
 0x2ef   :  { %v2953_v19 = vadd.f32 %v933_v4, %v932_v9  ;;  %v3037_v4 = vld [vmem:[%s3648_s2 + $0x190] sm:$0xff]  ;;  %v3043_v9 = vld [vmem:[%s3648_s2 + $0x168] sm:$0xff] }
 0x2f1   :  { %2001 = vtanh.f32 %v2953_v19 }
 0x2fe   :  { %v2002_v3 = vpop.eup %2001 }
 0x2ff   :  { %v936_v11 = vmul.f32 %v2002_v3, %v930_v8  ;;  %v3061_v8 = vld [vmem:[%s3648_s2 + $0x170] sm:$0xff]  ;;  %v3067_v3 = vld [vmem:[%s3648_s2 + $0x148] sm:$0xff] }
 0x301   :  { %1009 = vmatmul.mubr.f32.vlgmr.msra.gmra.mxu0 %v936_v11  ;;  %1080 = vmatmul.mubr.f32.vlgmr.msra.gmra.mxu1 %v936_v11  ;;  %v3073_v11 = vld [vmem:[%s3648_s2 + $0x158] sm:$0xff] }
 0x302   :  { %1116 = vmatpush1.msra.mxu0 %v2959_v7  ;;  %1187 = vmatpush1.msra.mxu1 %v2965_v16 }
 0x303   :  { %1117 = vmatprep.subr.mxu0 %v2971_v2  ;;  %1188 = vmatprep.subr.mxu1 %v2977_v10 }
 0x304   :  { %1118 = vmatpush1.msra.mxu0 %v2983_v26  ;;  %1189 = vmatpush1.msra.mxu1 %v2989_v15 }
 0x305   :  { %1119 = vmatprep.subr.mxu0 %v2995_v13  ;;  %1190 = vmatprep.subr.mxu1 %v3001_v5 }
 0x306   :  { %1120 = vmatpush1.msra.mxu0 %v3007_v12  ;;  %1191 = vmatpush1.msra.mxu1 %v3013_v17 }
 0x307   :  { %1121 = vmatprep.subr.mxu0 %v3019_v44  ;;  %1192 = vmatprep.subr.mxu1 %v3025_v62 }
 0x308   :  { %1122 = vmatpush1.msra.mxu0 %v3031_v18  ;;  %1193 = vmatpush1.msra.mxu1 %v3037_v4 }
 0x309   :  { %1123 = vmatprep.subr.mxu0 %v3043_v9  ;;  %1194 = vmatprep.subr.mxu1 %v3049_v6 }
 0x30a   :  { %1124 = vmatpush1.msra.mxu0 %v3055_v53  ;;  %1195 = vmatpush1.msra.mxu1 %v3061_v8 }
 0x30b   :  { %1125 = vmatprep.subr.mxu0 %v3067_v3  ;;  %1196 = vmatprep.subr.mxu1 %v3073_v11 }
 0x30c   :  { %1126 = vmatpush1.msra.mxu0 %v2356_v42  ;;  %1197 = vmatpush1.msra.mxu1 %v2361_v43  ;;  %v3123_v42 = vld [vmem:[%s3648_s2 + $0x1e8] sm:$0xff]  ;;  %v3129_v43 = vld [vmem:[%s3648_s2 + $0x1f8] sm:$0xff] }
 0x30d   :  { %1127 = vmatprep.subr.mxu0 %v2373_v45  ;;  %1198 = vmatprep.subr.mxu1 %v2378_v46  ;;  %3852 = vst [vmem:[#allocation7_spill] sm:$0xff] %v3123_v42  ;;  %3853 = vst [vmem:[#allocation8_spill] sm:$0xff] %v3129_v43 }
 0x30e   :  { %1128 = vmatpush1.msra.mxu0 %v2385_v47  ;;  %1199 = vmatpush1.msra.mxu1 %v2390_v48  ;;  %v3854_v47 = vld [vmem:[#allocation36_spill] sm:$0xff] }
 0x30f   :  { %1129 = vmatprep.subr.mxu0 %v2397_v49  ;;  %1200 = vmatprep.subr.mxu1 %v2402_v50 }
 0x310   :  { %1130 = vmatpush1.msra.mxu0 %v2411_v51  ;;  %1201 = vmatpush1.msra.mxu1 %v2416_v52  ;;  %v3855_v52 = vld [vmem:[#allocation38_spill] sm:$0xff] }
 0x311   :  { %1131 = vmatprep.subr.mxu0 %v2428_v54  ;;  %1202 = vmatprep.subr.mxu1 %v2433_v55 }
 0x312   :  { %1132 = vmatpush1.msra.mxu0 %v2440_v56  ;;  %1203 = vmatpush1.msra.mxu1 %v2445_v57  ;;  %v3856_v56 = vld [vmem:[#allocation39_spill] sm:$0xff] }
 0x313   :  { %1133 = vmatprep.subr.mxu0 %v2452_v58  ;;  %1204 = vmatprep.subr.mxu1 %v2457_v59  ;;  %v3857_v58 = vld [vmem:[#allocation37_spill] sm:$0xff] }
 0x314   :  { %1134 = vmatpush1.msra.mxu0 %v2466_v60  ;;  %1205 = vmatpush1.msra.mxu1 %v2471_v61 }
 0x315   :  { %1135 = vmatprep.subr.mxu0 %v2483_v63  ;;  %1206 = vmatprep.subr.mxu1 %v2488_v0 }
 0x316   :  { %1136 = vmatpush1.msra.mxu0 %v2495_v1  ;;  %1207 = vmatpush1.msra.mxu1 %v3798_v35 }
 0x317   :  { %1137 = vmatprep.subr.mxu0 %v3799_v14  ;;  %1208 = vmatprep.subr.mxu1 %v3826_v20 }
 0x318   :  { %1138 = vmatpush1.msra.mxu0 %v3827_v21  ;;  %1209 = vmatpush1.msra.mxu1 %v3828_v22 }
 0x319   :  { %1139 = vmatprep.subr.mxu0 %v3829_v23  ;;  %1210 = vmatprep.subr.mxu1 %v3830_v24 }
 0x31a   :  { %1140 = vmatpush1.msra.mxu0 %v3831_v25  ;;  %1211 = vmatpush1.msra.mxu1 %v3832_v27 }
 0x31b   :  { %1141 = vmatprep.subr.mxu0 %v3833_v28  ;;  %1212 = vmatprep.subr.mxu1 %v3834_v29 }
 0x31c   :  { %1142 = vmatpush1.msra.mxu0 %v3835_v30  ;;  %1213 = vmatpush1.msra.mxu1 %v3836_v31  ;;  %v3163_v30 = vld [vmem:[%s3648_s2 + $0x140] sm:$0xff]  ;;  %v3169_v31 = vld [vmem:[%s3648_s2 + $0x150] sm:$0xff] }
 0x31d   :  { %1143 = vmatprep.subr.mxu0 %v3837_v32  ;;  %1214 = vmatprep.subr.mxu1 %v3838_v33  ;;  %v3175_v32 = vld [vmem:[%s3648_s2 + $0x128] sm:$0xff]  ;;  %v3181_v33 = vld [vmem:[%s3648_s2 + $0x138] sm:$0xff] }
 0x31e   :  { %1144 = vmatpush1.msra.mxu0 %v3839_v34  ;;  %1215 = vmatpush1.msra.mxu1 %v3840_v36  ;;  %v3187_v34 = vld [vmem:[%s3648_s2 + $0x120] sm:$0xff]  ;;  %v3193_v36 = vld [vmem:[%s3648_s2 + $0x130] sm:$0xff] }
 0x31f   :  { %1145 = vmatprep.subr.mxu0 %v3841_v37  ;;  %1216 = vmatprep.subr.mxu1 %v3842_v38  ;;  %v3199_v37 = vld [vmem:[%s3648_s2 + $0x108] sm:$0xff]  ;;  %v3205_v38 = vld [vmem:[%s3648_s2 + $0x118] sm:$0xff] }
 0x320   :  { %1146 = vmatpush1.msra.mxu0 %v3843_v39  ;;  %1179 = vmatprep.mubr.f32.mxu0 %v3844_v40  ;;  %v3211_v39 = vld [vmem:[%s3648_s2 + $0x100] sm:$0xff] }
 0x321   :  { %1217 = vmatpush1.msra.mxu1 %v3845_v41  ;;  %1250 = vmatprep.mubr.f32.mxu1 %v3844_v40  ;;  %v3217_v41 = vld [vmem:[%s3648_s2 + $0x110] sm:$0xff] }
 0x322   :  { %1286 = vmatprep.subr.mxu0 %v3123_v42  ;;  %1357 = vmatprep.subr.mxu1 %v3129_v43 }
 0x3c1   :  { %v1010_v45 = vpop.f32.mrf.mxu0  ;;  %v1081_v46 = vpop.f32.mrf.mxu1 }
 0x3c2   :  { %v1086_v48 = vadd.f32 %v1010_v45, %v3854_v47  ;;  %v1088_v59 = vadd.f32 %v1081_v46, %v3857_v58  ;;  %v3229_v45 = vld [vmem:[%s3648_s2 + $0xf8] sm:$0xff]  ;;  %v3235_v46 = vld [vmem:[%s3648_s2 + $0xe0] sm:$0xff]  ;;  %v3241_v47 = vld [vmem:[%s3648_s2 + $0xf0] sm:$0xff] }
 0x3c3   :  { %v1012_v49 = vpop.f32.mrf.mxu0  ;;  %v1083_v50 = vpop.f32.mrf.mxu1  ;;  %v3301_v58 = vld [vmem:[%s3648_s2 + $0x98] sm:$0xff] }
 0x3c4   :  { %v1090_v51 = vmul.f32 0.5, %v1086_v48  ;;  %v1087_v54 = vadd.f32 %v1012_v49, %v3855_v52  ;;  %v1089_v57 = vadd.f32 %v1083_v50, %v3856_v56  ;;  %v1092_v60 = vmul.f32 0.5, %v1088_v59  ;;  %v3247_v48 = vld [vmem:[%s3648_s2 + $0xc8] sm:$0xff]  ;;  %v3253_v49 = vld [vmem:[%s3648_s2 + $0xd8] sm:$0xff]  ;;  %v3259_v50 = vld [vmem:[%s3648_s2 + $0xc0] sm:$0xff]  ;;  %3858 = vst [vmem:[#allocation28_spill] sm:$0xff] %v3301_v58 }
 0x3c5   :  { %v3271_v52 = vld [vmem:[%s3648_s2 + $0xa8] sm:$0xff]  ;;  %v3289_v56 = vld [vmem:[%s3648_s2 + $0xb0] sm:$0xff]  ;;  %v3307_v59 = vld [vmem:[%s3648_s2 + $0x80] sm:$0xff] }
 0x3c6   :  { %2003 = vtanh.f32 %v1090_v51  ;;  %v1091_v55 = vmul.f32 0.5, %v1087_v54  ;;  %v3265_v51 = vld [vmem:[%s3648_s2 + $0xd0] sm:$0xff]  ;;  %v3277_v54 = vld [vmem:[%s3648_s2 + $0xb8] sm:$0xff]  ;;  %3859 = vst [vmem:[#allocation30_spill] sm:$0xff] %v3307_v59 }
 0x3c8   :  { %2005 = vtanh.f32 %v1091_v55  ;;  %v3283_v55 = vld [vmem:[%s3648_s2 + $0xa0] sm:$0xff] }
 0x3c9   :  { %2007 = vtanh.f32 %v1089_v57  ;;  %v3295_v57 = vld [vmem:[%s3648_s2 + $0x88] sm:$0xff] }
 0x3ca   :  { %2009 = vtanh.f32 %v1092_v60  ;;  %v3313_v60 = vld [vmem:[%s3648_s2 + $0x90] sm:$0xff] }
 0x3cb   :  { %3860 = vst [vmem:[#allocation31_spill] sm:$0xff] %v3313_v60 }
 0x3d3   :  { %v2004_v61 = vpop.eup %2003 }
 0x3d4   :  { %v1096_v63 = vmul.f32 0.5, %v2004_v61  ;;  %v3319_v61 = vld [vmem:[%s3648_s2 + $0x68] sm:$0xff] }
 0x3d5   :  { %v2006_v0 = vpop.eup %2005  ;;  %3861 = vst [vmem:[#allocation29_spill] sm:$0xff] %v3319_v61 }
 0x3d6   :  { %v1099_v1 = vadd.f32 0.5, %v1096_v63  ;;  %v1097_v35 = vmul.f32 0.5, %v2006_v0  ;;  %v2008_v14 = vpop.eup %2007  ;;  %v3325_v63 = vld [vmem:[%s3648_s2 + $0x78] sm:$0xff]  ;;  %v3331_v0 = vld [vmem:[%s3648_s2 + $0x60] sm:$0xff] }
 0x3d7   :  { %v2010_v24 = vpop.eup %2009  ;;  %3862 = vst [vmem:[#allocation9_spill] sm:$0xff] %v3325_v63  ;;  %3863 = vst [vmem:[#allocation10_spill] sm:$0xff] %v3331_v0 }
 0x3d8   :  { %v1100_v20 = vadd.f32 0.5, %v1097_v35  ;;  %v1104_v21 = vmul.f32 %v2008_v14, %v1099_v1  ;;  %v1098_v25 = vmul.f32 0.5, %v2010_v24  ;;  %v3337_v1 = vld [vmem:[%s3648_s2 + $0x70] sm:$0xff]  ;;  %v3343_v35 = vld [vmem:[%s3648_s2 + $0x48] sm:$0xff]  ;;  %v3349_v14 = vld [vmem:[%s3648_s2 + $0x58] sm:$0xff] }
 0x3d9   :  { %3864 = vst [vmem:[#allocation11_spill] sm:$0xff] %v3337_v1  ;;  %3865 = vst [vmem:[#allocation12_spill] sm:$0xff] %v3343_v35  ;;  %v3373_v24 = vld [vmem:[%s3648_s2 + $0x38] sm:$0xff] }
 0x3da   :  { %v1103_v22 = vmul.f32 %v1100_v20, %v2953_v19  ;;  %v1101_v27 = vadd.f32 0.5, %v1098_v25  ;;  %v3223_v19 = vld [vmem:[%s3648_s2 + $0xe8] sm:$0xff]  ;;  %3866 = vst [vmem:[#allocation13_spill] sm:$0xff] %v3349_v14  ;;  %v3355_v20 = vld [vmem:[%s3648_s2 + $0x40] sm:$0xff]  ;;  %3870 = vst [vmem:[#allocation17_spill] sm:$0xff] %v3373_v24 }
 0x3db   :  { %3867 = vst [vmem:[#allocation14_spill] sm:$0xff] %v3355_v20  ;;  %v3379_v25 = vld [vmem:[%s3648_s2 + $0x20] sm:$0xff] }
 0x3dc   :  { %v3137_v23 = vadd.f32 %v1104_v21, %v1103_v22  ;;  %v3361_v21 = vld [vmem:[%s3648_s2 + $0x50] sm:$0xff]  ;;  %v3367_v22 = vld [vmem:[%s3648_s2 + $0x28] sm:$0xff]  ;;  %3871 = vst [vmem:[#allocation18_spill] sm:$0xff] %v3379_v25 }
 0x3dd   :  { %3868 = vst [vmem:[#allocation15_spill] sm:$0xff] %v3361_v21  ;;  %3869 = vst [vmem:[#allocation16_spill] sm:$0xff] %v3367_v22 }
 0x3de   :  { %2011 = vtanh.f32 %v3137_v23 }
 0x3eb   :  { %v2012_v28 = vpop.eup %2011 }
 0x3ec   :  { %v1107_v29 = vmul.f32 %v2012_v28, %v1101_v27  ;;  %v3385_v27 = vld [vmem:[%s3648_s2 + $0x30] sm:$0xff]  ;;  %v3391_v28 = vld [vmem:[%s3648_s2 + $0x8] sm:$0xff] }
 0x3ed   :  { %3872 = vst [vmem:[#allocation19_spill] sm:$0xff] %v3385_v27  ;;  %3873 = vst [vmem:[#allocation20_spill] sm:$0xff] %v3391_v28 }
 0x3ee   :  { %1180 = vmatmul.mubr.f32.vlgmr.msra.gmra.mxu0 %v1107_v29  ;;  %1251 = vmatmul.mubr.f32.vlgmr.msra.gmra.mxu1 %v1107_v29  ;;  %v3397_v29 = vld [vmem:[%s3648_s2 + $0x18] sm:$0xff] }
 0x3ef   :  { %1287 = vmatpush1.msra.mxu0 %v2959_v7  ;;  %1358 = vmatpush1.msra.mxu1 %v2965_v16  ;;  %3874 = vst [vmem:[#allocation21_spill] sm:$0xff] %v3397_v29 }
 0x3f0   :  { %1288 = vmatprep.subr.mxu0 %v2971_v2  ;;  %1359 = vmatprep.subr.mxu1 %v2977_v10 }
 0x3f1   :  { %1289 = vmatpush1.msra.mxu0 %v2983_v26  ;;  %1360 = vmatpush1.msra.mxu1 %v2989_v15 }
 0x3f2   :  { %1290 = vmatprep.subr.mxu0 %v2995_v13  ;;  %1361 = vmatprep.subr.mxu1 %v3001_v5 }
 0x3f3   :  { %1291 = vmatpush1.msra.mxu0 %v3007_v12  ;;  %1362 = vmatpush1.msra.mxu1 %v3013_v17 }
 0x3f4   :  { %1292 = vmatprep.subr.mxu0 %v3019_v44  ;;  %1363 = vmatprep.subr.mxu1 %v3025_v62 }
 0x3f5   :  { %1293 = vmatpush1.msra.mxu0 %v3031_v18  ;;  %1364 = vmatpush1.msra.mxu1 %v3037_v4 }
 0x3f6   :  { %1294 = vmatprep.subr.mxu0 %v3043_v9  ;;  %1365 = vmatprep.subr.mxu1 %v3049_v6 }
 0x3f7   :  { %1295 = vmatpush1.msra.mxu0 %v3055_v53  ;;  %1366 = vmatpush1.msra.mxu1 %v3061_v8 }
 0x3f8   :  { %1296 = vmatprep.subr.mxu0 %v3067_v3  ;;  %1367 = vmatprep.subr.mxu1 %v3073_v11 }
 0x3f9   :  { %1297 = vmatpush1.msra.mxu0 %v3163_v30  ;;  %1368 = vmatpush1.msra.mxu1 %v3169_v31 }
 0x3fa   :  { %1298 = vmatprep.subr.mxu0 %v3175_v32  ;;  %1369 = vmatprep.subr.mxu1 %v3181_v33 }
 0x3fb   :  { %1299 = vmatpush1.msra.mxu0 %v3187_v34  ;;  %1370 = vmatpush1.msra.mxu1 %v3193_v36 }
 0x3fc   :  { %1300 = vmatprep.subr.mxu0 %v3199_v37  ;;  %1371 = vmatprep.subr.mxu1 %v3205_v38 }
 0x3fd   :  { %1301 = vmatpush1.msra.mxu0 %v3211_v39  ;;  %1372 = vmatpush1.msra.mxu1 %v3217_v41 }
 0x3fe   :  { %1302 = vmatprep.subr.mxu0 %v3223_v19  ;;  %1373 = vmatprep.subr.mxu1 %v3229_v45 }
 0x3ff   :  { %1303 = vmatpush1.msra.mxu0 %v3235_v46  ;;  %1374 = vmatpush1.msra.mxu1 %v3241_v47 }
 0x400   :  { %1304 = vmatprep.subr.mxu0 %v3247_v48  ;;  %1375 = vmatprep.subr.mxu1 %v3253_v49 }
 0x401   :  { %1305 = vmatpush1.msra.mxu0 %v3259_v50  ;;  %1376 = vmatpush1.msra.mxu1 %v3265_v51 }
 0x402   :  { %1306 = vmatprep.subr.mxu0 %v3271_v52  ;;  %1377 = vmatprep.subr.mxu1 %v3277_v54 }
 0x403   :  { %1307 = vmatpush1.msra.mxu0 %v3283_v55  ;;  %1378 = vmatpush1.msra.mxu1 %v3289_v56 }
 0x404   :  { %1308 = vmatprep.subr.mxu0 %v3295_v57  ;;  %1379 = vmatprep.subr.mxu1 %v3301_v58 }
 0x405   :  { %1309 = vmatpush1.msra.mxu0 %v3307_v59  ;;  %1380 = vmatpush1.msra.mxu1 %v3313_v60 }
 0x406   :  { %1310 = vmatprep.subr.mxu0 %v3319_v61  ;;  %1381 = vmatprep.subr.mxu1 %v3325_v63 }
 0x407   :  { %1311 = vmatpush1.msra.mxu0 %v3331_v0  ;;  %1382 = vmatpush1.msra.mxu1 %v3337_v1  ;;  %v3879_v0 = vld [vmem:[#allocation43_spill] sm:$0xff] }
 0x408   :  { %1312 = vmatprep.subr.mxu0 %v3343_v35  ;;  %1383 = vmatprep.subr.mxu1 %v3349_v14  ;;  %v3878_v14 = vld [vmem:[#allocation42_spill] sm:$0xff] }
 0x409   :  { %1313 = vmatpush1.msra.mxu0 %v3355_v20  ;;  %1384 = vmatpush1.msra.mxu1 %v3361_v21 }
 0x40a   :  { %1314 = vmatprep.subr.mxu0 %v3367_v22  ;;  %1385 = vmatprep.subr.mxu1 %v3373_v24  ;;  %v3877_v24 = vld [vmem:[#allocation40_spill] sm:$0xff] }
 0x40b   :  { %1315 = vmatpush1.msra.mxu0 %v3379_v25  ;;  %1386 = vmatpush1.msra.mxu1 %v3385_v27  ;;  %v3403_v25 = vld [vmem:[%s3648_s2] sm:$0xff] }
 0x40c   :  { %1316 = vmatprep.subr.mxu0 %v3391_v28  ;;  %1387 = vmatprep.subr.mxu1 %v3397_v29  ;;  %3875 = vst [vmem:[#allocation22_spill] sm:$0xff] %v3403_v25  ;;  %v3410_v28 = vld [vmem:[%s3648_s2 + $0x10] sm:$0xff] }
 0x40d   :  { %1317 = vmatpush1.msra.mxu0 %v3403_v25  ;;  %1350 = vmatprep.mubr.f32.mxu0 %v3844_v40  ;;  %3876 = vst [vmem:[#allocation23_spill] sm:$0xff] %v3410_v28 }
 0x40e   :  { %1388 = vmatpush1.msra.mxu1 %v3410_v28  ;;  %1421 = vmatprep.mubr.f32.mxu1 %v3844_v40  ;;  %v3880_v28 = vld [vmem:[#allocation41_spill] sm:$0xff] }
 0x40f   :  { %1457 = vmatprep.subr.mxu0 %v3123_v42  ;;  %1528 = vmatprep.subr.mxu1 %v3129_v43 }
 0x4ae   :  { %v1181_v29 = vpop.f32.mrf.mxu0  ;;  %v1252_v27 = vpop.f32.mrf.mxu1 }
 0x4af   :  { %v1257_v22 = vadd.f32 %v1181_v29, %v3877_v24  ;;  %v1259_v40 = vadd.f32 %v1252_v27, %v3880_v28  ;;  %v3890_v27 = vld [vmem:[#allocation14_spill] sm:$0xff]  ;;  %v3891_v28 = vld [vmem:[#allocation15_spill] sm:$0xff] }
 0x4b0   :  { %v1183_v25 = vpop.f32.mrf.mxu0  ;;  %v1254_v21 = vpop.f32.mrf.mxu1 }
 0x4b1   :  { %v1261_v20 = vmul.f32 0.5, %v1257_v22  ;;  %v1258_v35 = vadd.f32 %v1183_v25, %v3878_v14  ;;  %v1260_v63 = vadd.f32 %v1254_v21, %v3879_v0  ;;  %v1263_v42 = vmul.f32 0.5, %v1259_v40  ;;  %v3888_v21 = vld [vmem:[#allocation12_spill] sm:$0xff]  ;;  %v3889_v25 = vld [vmem:[#allocation13_spill] sm:$0xff] }
 0x4b3   :  { %2013 = vtanh.f32 %v1261_v20  ;;  %v1262_v1 = vmul.f32 0.5, %v1258_v35 }
 0x4b5   :  { %2015 = vtanh.f32 %v1262_v1 }
 0x4b6   :  { %2017 = vtanh.f32 %v1260_v63 }
 0x4b7   :  { %2019 = vtanh.f32 %v1263_v42  ;;  %v3881_v42 = vld [vmem:[#allocation28_spill] sm:$0xff] }
 0x4c0   :  { %v2014_v61 = vpop.eup %2013 }
 0x4c1   :  { %v1267_v43 = vmul.f32 0.5, %v2014_v61  ;;  %v3887_v61 = vld [vmem:[#allocation11_spill] sm:$0xff] }
 0x4c2   :  { %v2016_v60 = vpop.eup %2015 }
 0x4c3   :  { %v1270_v59 = vadd.f32 0.5, %v1267_v43  ;;  %v1268_v24 = vmul.f32 0.5, %v2016_v60  ;;  %v2018_v29 = vpop.eup %2017  ;;  %v3882_v43 = vld [vmem:[#allocation30_spill] sm:$0xff] }
 0x4c4   :  { %v2020_v0 = vpop.eup %2019  ;;  %v3886_v60 = vld [vmem:[#allocation10_spill] sm:$0xff] }
 0x4c5   :  { %v1271_v58 = vadd.f32 0.5, %v1268_v24  ;;  %v1275_v22 = vmul.f32 %v2018_v29, %v1270_v59  ;;  %v1269_v63 = vmul.f32 0.5, %v2020_v0  ;;  %v3885_v59 = vld [vmem:[#allocation9_spill] sm:$0xff]  ;;  %v3892_v24 = vld [vmem:[#allocation16_spill] sm:$0xff] }
 0x4c6   :  { %v3893_v29 = vld [vmem:[#allocation17_spill] sm:$0xff]  ;;  %v3896_v0 = vld [vmem:[#allocation20_spill] sm:$0xff] }
 0x4c7   :  { %v1274_v14 = vmul.f32 %v1271_v58, %v3137_v23  ;;  %v1272_v1 = vadd.f32 0.5, %v1269_v63  ;;  %v3883_v23 = vld [vmem:[#allocation31_spill] sm:$0xff]  ;;  %v3884_v58 = vld [vmem:[#allocation29_spill] sm:$0xff] }
 0x4c8   :  { %v3897_v63 = vld [vmem:[#allocation21_spill] sm:$0xff] }
 0x4c9   :  { %v3421_v20 = vadd.f32 %v1275_v22, %v1274_v14  ;;  %v3894_v22 = vld [vmem:[#allocation18_spill] sm:$0xff]  ;;  %v3895_v14 = vld [vmem:[#allocation19_spill] sm:$0xff] }
 0x4cb   :  { %2021 = vtanh.f32 %v3421_v20 }
 0x4d8   :  { %v2022_v35 = vpop.eup %2021 }
 0x4d9   :  { %v1278_v40 = vmul.f32 %v2022_v35, %v1272_v1  ;;  %v3898_v1 = vld [vmem:[#allocation22_spill] sm:$0xff]  ;;  %v3899_v35 = vmov 0.0  }
 0x4db   :  { %1351 = vmatmul.mubr.f32.vlgmr.msra.gmra.mxu0 %v1278_v40  ;;  %1422 = vmatmul.mubr.f32.vlgmr.msra.gmra.mxu1 %v1278_v40  ;;  %v3900_v40 = vld [vmem:[#allocation23_spill] sm:$0xff] }
 0x4dc   :  { %1458 = vmatpush1.msra.mxu0 %v2959_v7  ;;  %1529 = vmatpush1.msra.mxu1 %v2965_v16 }
 0x4dd   :  { %1459 = vmatprep.subr.mxu0 %v2971_v2  ;;  %1530 = vmatprep.subr.mxu1 %v2977_v10 }
 0x4de   :  { %1460 = vmatpush1.msra.mxu0 %v2983_v26  ;;  %1531 = vmatpush1.msra.mxu1 %v2989_v15 }
 0x4df   :  { %1461 = vmatprep.subr.mxu0 %v2995_v13  ;;  %1532 = vmatprep.subr.mxu1 %v3001_v5 }
 0x4e0   :  { %1462 = vmatpush1.msra.mxu0 %v3007_v12  ;;  %1533 = vmatpush1.msra.mxu1 %v3013_v17 }
 0x4e1   :  { %1463 = vmatprep.subr.mxu0 %v3019_v44  ;;  %1534 = vmatprep.subr.mxu1 %v3025_v62 }
 0x4e2   :  { %1464 = vmatpush1.msra.mxu0 %v3031_v18  ;;  %1535 = vmatpush1.msra.mxu1 %v3037_v4 }
 0x4e3   :  { %1465 = vmatprep.subr.mxu0 %v3043_v9  ;;  %1536 = vmatprep.subr.mxu1 %v3049_v6 }
 0x4e4   :  { %1466 = vmatpush1.msra.mxu0 %v3055_v53  ;;  %1537 = vmatpush1.msra.mxu1 %v3061_v8 }
 0x4e5   :  { %1467 = vmatprep.subr.mxu0 %v3067_v3  ;;  %1538 = vmatprep.subr.mxu1 %v3073_v11 }
 0x4e6   :  { %1468 = vmatpush1.msra.mxu0 %v3163_v30  ;;  %1539 = vmatpush1.msra.mxu1 %v3169_v31 }
 0x4e7   :  { %1469 = vmatprep.subr.mxu0 %v3175_v32  ;;  %1540 = vmatprep.subr.mxu1 %v3181_v33 }
 0x4e8   :  { %1470 = vmatpush1.msra.mxu0 %v3187_v34  ;;  %1541 = vmatpush1.msra.mxu1 %v3193_v36 }
 0x4e9   :  { %1471 = vmatprep.subr.mxu0 %v3199_v37  ;;  %1542 = vmatprep.subr.mxu1 %v3205_v38 }
 0x4ea   :  { %1472 = vmatpush1.msra.mxu0 %v3211_v39  ;;  %1543 = vmatpush1.msra.mxu1 %v3217_v41 }
 0x4eb   :  { %1473 = vmatprep.subr.mxu0 %v3223_v19  ;;  %1544 = vmatprep.subr.mxu1 %v3229_v45 }
 0x4ec   :  { %1474 = vmatpush1.msra.mxu0 %v3235_v46  ;;  %1545 = vmatpush1.msra.mxu1 %v3241_v47 }
 0x4ed   :  { %1475 = vmatprep.subr.mxu0 %v3247_v48  ;;  %1546 = vmatprep.subr.mxu1 %v3253_v49 }
 0x4ee   :  { %1476 = vmatpush1.msra.mxu0 %v3259_v50  ;;  %1547 = vmatpush1.msra.mxu1 %v3265_v51 }
 0x4ef   :  { %1477 = vmatprep.subr.mxu0 %v3271_v52  ;;  %1548 = vmatprep.subr.mxu1 %v3277_v54 }
 0x4f0   :  { %1478 = vmatpush1.msra.mxu0 %v3283_v55  ;;  %1549 = vmatpush1.msra.mxu1 %v3289_v56 }
 0x4f1   :  { %1479 = vmatprep.subr.mxu0 %v3295_v57  ;;  %1550 = vmatprep.subr.mxu1 %v3881_v42 }
 0x4f2   :  { %1480 = vmatpush1.msra.mxu0 %v3882_v43  ;;  %1551 = vmatpush1.msra.mxu1 %v3883_v23 }
 0x4f3   :  { %1481 = vmatprep.subr.mxu0 %v3884_v58  ;;  %1552 = vmatprep.subr.mxu1 %v3885_v59 }
 0x4f4   :  { %1482 = vmatpush1.msra.mxu0 %v3886_v60  ;;  %1553 = vmatpush1.msra.mxu1 %v3887_v61  ;;  %v3905_v60 = vld [vmem:[#allocation47_spill] sm:$0xff] }
 0x4f5   :  { %1483 = vmatprep.subr.mxu0 %v3888_v21  ;;  %1554 = vmatprep.subr.mxu1 %v3889_v25 }
 0x4f6   :  { %1484 = vmatpush1.msra.mxu0 %v3890_v27  ;;  %1555 = vmatpush1.msra.mxu1 %v3891_v28  ;;  %v3901_v28 = vld [vmem:[#allocation7_spill] sm:$0xff]  ;;  %v3903_v27 = vld [vmem:[#allocation44_spill] sm:$0xff] }
 0x4f7   :  { %1485 = vmatprep.subr.mxu0 %v3892_v24  ;;  %1556 = vmatprep.subr.mxu1 %v3893_v29  ;;  %v3902_v24 = vld [vmem:[#allocation8_spill] sm:$0xff] }
 0x4f8   :  { %1486 = vmatpush1.msra.mxu0 %v3894_v22  ;;  %1557 = vmatpush1.msra.mxu1 %v3895_v14 }
 0x4f9   :  { %1487 = vmatprep.subr.mxu0 %v3896_v0  ;;  %1558 = vmatprep.subr.mxu1 %v3897_v63  ;;  %v3904_v63 = vld [vmem:[#allocation46_spill] sm:$0xff] }
 0x4fa   :  { %1488 = vmatpush1.msra.mxu0 %v3898_v1  ;;  %1521 = vmatprep.mubr.f32.mxu0 %v3899_v35 }
 0x4fb   :  { %1559 = vmatpush1.msra.mxu1 %v3900_v40  ;;  %1592 = vmatprep.mubr.f32.mxu1 %v3899_v35  ;;  %v3906_v40 = vld [vmem:[#allocation45_spill] sm:$0xff] }
 0x4fc   :  { %1628 = vmatprep.subr.mxu0 %v3901_v28  ;;  %1699 = vmatprep.subr.mxu1 %v3902_v24 }
 0x59b   :  { %v1352_v29 = vpop.f32.mrf.mxu0  ;;  %v1423_v22 = vpop.f32.mrf.mxu1 }
 0x59c   :  { %v1428_v14 = vadd.f32 %v1352_v29, %v3903_v27  ;;  %v1430_v35 = vadd.f32 %v1423_v22, %v3906_v40  ;;  %v1811_v40 = vld [vmem:[%s3650_s4 + $0x70] sm:$0xff] }
 0x59d   :  { %v1354_v25 = vpop.f32.mrf.mxu0  ;;  %v1425_v0 = vpop.f32.mrf.mxu1 }
 0x59e   :  { %v1432_v21 = vmul.f32 0.5, %v1428_v14  ;;  %v1429_v61 = vadd.f32 %v1354_v25, %v3904_v63  ;;  %v1431_v59 = vadd.f32 %v1425_v0, %v3905_v60  ;;  %v1434_v28 = vmul.f32 0.5, %v1430_v35  ;;  %v1812_v35 = vld [vmem:[%s3650_s4 + $0x78] sm:$0xff] }
 0x5a0   :  { %2023 = vtanh.f32 %v1432_v21  ;;  %v1433_v1 = vmul.f32 0.5, %v1429_v61 }
 0x5a2   :  { %2025 = vtanh.f32 %v1433_v1 }
 0x5a3   :  { %2027 = vtanh.f32 %v1431_v59 }
 0x5a4   :  { %2029 = vtanh.f32 %v1434_v28  ;;  %v1810_v28 = vld [vmem:[%s3650_s4 + $0x68] sm:$0xff] }
 0x5ad   :  { %v2024_v58 = vpop.eup %2023 }
 0x5ae   :  { %v1438_v24 = vmul.f32 0.5, %v2024_v58 }
 0x5af   :  { %v2026_v23 = vpop.eup %2025 }
 0x5b0   :  { %v1441_v43 = vadd.f32 0.5, %v1438_v24  ;;  %v1439_v27 = vmul.f32 0.5, %v2026_v23  ;;  %v2028_v29 = vpop.eup %2027  ;;  %v1809_v24 = vld [vmem:[%s3650_s4 + $0x60] sm:$0xff] }
 0x5b1   :  { %v2030_v60 = vpop.eup %2029 }
 0x5b2   :  { %v1442_v42 = vadd.f32 0.5, %v1439_v27  ;;  %v1446_v14 = vmul.f32 %v2028_v29, %v1441_v43  ;;  %v1440_v59 = vmul.f32 0.5, %v2030_v60  ;;  %v1808_v27 = vld [vmem:[%s3650_s4 + $0x58] sm:$0xff]  ;;  %v1807_v29 = vld [vmem:[%s3650_s4 + $0x50] sm:$0xff] }
 0x5b3   :  { %v1803_v60 = vld [vmem:[%s3650_s4 + $0x30] sm:$0xff] }
 0x5b4   :  { %v1445_v25 = vmul.f32 %v1442_v42, %v3421_v20  ;;  %v1443_v61 = vadd.f32 0.5, %v1440_v59  ;;  %v1802_v59 = vld [vmem:[%s3650_s4 + $0x28] sm:$0xff] }
 0x5b6   :  { %v3495_v21 = vadd.f32 %v1446_v14, %v1445_v25  ;;  %v1806_v14 = vld [vmem:[%s3650_s4 + $0x48] sm:$0xff]  ;;  %v1805_v25 = vld [vmem:[%s3650_s4 + $0x40] sm:$0xff] }
 0x5b8   :  { %2031 = vtanh.f32 %v3495_v21 }
 0x5c5   :  { %v2032_v22 = vpop.eup %2031 }
 0x5c6   :  { %v1449_v0 = vmul.f32 %v2032_v22, %v1443_v61  ;;  %v1801_v61 = vld [vmem:[%s3650_s4 + $0x20] sm:$0xff]  ;;  %v1800_v22 = vld [vmem:[%s3650_s4 + $0x18] sm:$0xff] }
 0x5c8   :  { %1522 = vmatmul.mubr.f32.vlgmr.msra.gmra.mxu0 %v1449_v0  ;;  %1593 = vmatmul.mubr.f32.vlgmr.msra.gmra.mxu1 %v1449_v0  ;;  %v1799_v0 = vld [vmem:[%s3650_s4 + $0x10] sm:$0xff] }
 0x5c9   :  { %1629 = vmatpush1.msra.mxu0 %v2959_v7  ;;  %1700 = vmatpush1.msra.mxu1 %v2965_v16  ;;  %v3907_v7 = vld [vmem:[#allocation28_spill] sm:$0xff]  ;;  %v3908_v16 = vld [vmem:[#allocation30_spill] sm:$0xff] }
 0x5ca   :  { %1630 = vmatprep.subr.mxu0 %v2971_v2  ;;  %1701 = vmatprep.subr.mxu1 %v2977_v10  ;;  %v3909_v2 = vld [vmem:[#allocation31_spill] sm:$0xff]  ;;  %v3910_v10 = vld [vmem:[#allocation29_spill] sm:$0xff] }
 0x5cb   :  { %1631 = vmatpush1.msra.mxu0 %v2983_v26  ;;  %1702 = vmatpush1.msra.mxu1 %v2989_v15  ;;  %v3911_v26 = vld [vmem:[#allocation9_spill] sm:$0xff]  ;;  %v3912_v15 = vld [vmem:[#allocation10_spill] sm:$0xff] }
 0x5cc   :  { %1632 = vmatprep.subr.mxu0 %v2995_v13  ;;  %1703 = vmatprep.subr.mxu1 %v3001_v5  ;;  %v3913_v13 = vld [vmem:[#allocation11_spill] sm:$0xff]  ;;  %v3914_v5 = vld [vmem:[#allocation12_spill] sm:$0xff] }
 0x5cd   :  { %1633 = vmatpush1.msra.mxu0 %v3007_v12  ;;  %1704 = vmatpush1.msra.mxu1 %v3013_v17  ;;  %v3915_v12 = vld [vmem:[#allocation13_spill] sm:$0xff]  ;;  %v3916_v17 = vld [vmem:[#allocation14_spill] sm:$0xff] }
 0x5ce   :  { %1634 = vmatprep.subr.mxu0 %v3019_v44  ;;  %1705 = vmatprep.subr.mxu1 %v3025_v62  ;;  %v3917_v44 = vld [vmem:[#allocation15_spill] sm:$0xff]  ;;  %v3918_v62 = vld [vmem:[#allocation16_spill] sm:$0xff] }
 0x5cf   :  { %1635 = vmatpush1.msra.mxu0 %v3031_v18  ;;  %1706 = vmatpush1.msra.mxu1 %v3037_v4  ;;  %v3919_v18 = vld [vmem:[#allocation17_spill] sm:$0xff]  ;;  %v3920_v4 = vld [vmem:[#allocation18_spill] sm:$0xff] }
 0x5d0   :  { %1636 = vmatprep.subr.mxu0 %v3043_v9  ;;  %1707 = vmatprep.subr.mxu1 %v3049_v6  ;;  %v3921_v9 = vld [vmem:[#allocation19_spill] sm:$0xff]  ;;  %v3922_v6 = vld [vmem:[#allocation20_spill] sm:$0xff] }
 0x5d1   :  { %1637 = vmatpush1.msra.mxu0 %v3055_v53  ;;  %1708 = vmatpush1.msra.mxu1 %v3061_v8  ;;  %v3923_v53 = vld [vmem:[#allocation21_spill] sm:$0xff]  ;;  %v3924_v8 = vld [vmem:[#allocation22_spill] sm:$0xff] }
 0x5d2   :  { %1638 = vmatprep.subr.mxu0 %v3067_v3  ;;  %1709 = vmatprep.subr.mxu1 %v3073_v11  ;;  %v3925_v3 = vmov 0.0   ;;  %v3926_v11 = vld [vmem:[#allocation23_spill] sm:$0xff] }
 0x5d3   :  { %1639 = vmatpush1.msra.mxu0 %v3163_v30  ;;  %1710 = vmatpush1.msra.mxu1 %v3169_v31 }
 0x5d4   :  { %1640 = vmatprep.subr.mxu0 %v3175_v32  ;;  %1711 = vmatprep.subr.mxu1 %v3181_v33  ;;  %v3927_v32 = vld [vmem:[#allocation48_spill] sm:$0xff] }
 0x5d5   :  { %1641 = vmatpush1.msra.mxu0 %v3187_v34  ;;  %1712 = vmatpush1.msra.mxu1 %v3193_v36 }
 0x5d6   :  { %1642 = vmatprep.subr.mxu0 %v3199_v37  ;;  %1713 = vmatprep.subr.mxu1 %v3205_v38  ;;  %v3928_v38 = vld [vmem:[#allocation50_spill] sm:$0xff] }
 0x5d7   :  { %1643 = vmatpush1.msra.mxu0 %v3211_v39  ;;  %1714 = vmatpush1.msra.mxu1 %v3217_v41 }
 0x5d8   :  { %1644 = vmatprep.subr.mxu0 %v3223_v19  ;;  %1715 = vmatprep.subr.mxu1 %v3229_v45  ;;  %v3929_v19 = vld [vmem:[#allocation51_spill] sm:$0xff] }
 0x5d9   :  { %1645 = vmatpush1.msra.mxu0 %v3235_v46  ;;  %1716 = vmatpush1.msra.mxu1 %v3241_v47  ;;  %v3930_v46 = vld [vmem:[#allocation49_spill] sm:$0xff] }
 0x5da   :  { %1646 = vmatprep.subr.mxu0 %v3247_v48  ;;  %1717 = vmatprep.subr.mxu1 %v3253_v49 }
 0x5db   :  { %1647 = vmatpush1.msra.mxu0 %v3259_v50  ;;  %1718 = vmatpush1.msra.mxu1 %v3265_v51 }
 0x5dc   :  { %1648 = vmatprep.subr.mxu0 %v3271_v52  ;;  %1719 = vmatprep.subr.mxu1 %v3277_v54 }
 0x5dd   :  { %1649 = vmatpush1.msra.mxu0 %v3283_v55  ;;  %1720 = vmatpush1.msra.mxu1 %v3289_v56 }
 0x5de   :  { %1650 = vmatprep.subr.mxu0 %v3295_v57  ;;  %1721 = vmatprep.subr.mxu1 %v3907_v7  ;;  %v1798_v7 = vld [vmem:[%s3650_s4 + $0x8] sm:$0xff] }
 0x5df   :  { %1651 = vmatpush1.msra.mxu0 %v3908_v16  ;;  %1722 = vmatpush1.msra.mxu1 %v3909_v2  ;;  %v1797_v16 = vld [vmem:[%s3650_s4] sm:$0xff] }
 0x5e0   :  { %1652 = vmatprep.subr.mxu0 %v3910_v10  ;;  %1723 = vmatprep.subr.mxu1 %v3911_v26  ;;  %v3931_v26 = vld [vmem:[#allocation52_spill] sm:$0xff] }
 0x5e1   :  { %1653 = vmatpush1.msra.mxu0 %v3912_v15  ;;  %1724 = vmatpush1.msra.mxu1 %v3913_v13 }
 0x5e2   :  { %1654 = vmatprep.subr.mxu0 %v3914_v5  ;;  %1725 = vmatprep.subr.mxu1 %v3915_v12 }
 0x5e3   :  { %1655 = vmatpush1.msra.mxu0 %v3916_v17  ;;  %1726 = vmatpush1.msra.mxu1 %v3917_v44  ;;  %v3932_v17 = vld [vmem:[#allocation54_spill] sm:$0xff] }
 0x5e4   :  { %1656 = vmatprep.subr.mxu0 %v3918_v62  ;;  %1727 = vmatprep.subr.mxu1 %v3919_v18  ;;  %v3933_v18 = vld [vmem:[#allocation55_spill] sm:$0xff] }
 0x5e5   :  { %1657 = vmatpush1.msra.mxu0 %v3920_v4  ;;  %1728 = vmatpush1.msra.mxu1 %v3921_v9  ;;  %v3934_v9 = vld [vmem:[#allocation53_spill] sm:$0xff] }
 0x5e6   :  { %1658 = vmatprep.subr.mxu0 %v3922_v6  ;;  %1729 = vmatprep.subr.mxu1 %v3923_v53 }
 0x5e7   :  { %1659 = vmatpush1.msra.mxu0 %v3924_v8  ;;  %1692 = vmatprep.mubr.f32.mxu0 %v3925_v3 }
 0x5e8   :  { %1730 = vmatpush1.msra.mxu1 %v3926_v11  ;;  %1763 = vmatprep.mubr.f32.mxu1 %v3925_v3 }
 0x5e9   :  { %1936 = vmatprep.subr.mxu0 %v3925_v3 }
 0x688   :  { %v1523_v30 = vpop.f32.mrf.mxu0  ;;  %v1594_v31 = vpop.f32.mrf.mxu1 }
 0x689   :  { %v1599_v33 = vadd.f32 %v1523_v30, %v3927_v32  ;;  %v1601_v47 = vadd.f32 %v1594_v31, %v3930_v46  ;;  %v1918_v46 = vld [vmem:[%s3651_s5] ss:$0 sm:$0xff] }
 0x68a   :  { %v1525_v34 = vpop.f32.mrf.mxu0  ;;  %v1596_v36 = vpop.f32.mrf.mxu1 }
 0x68b   :  { %v1603_v37 = vmul.f32 0.5, %v1599_v33  ;;  %v1600_v39 = vadd.f32 %v1525_v34, %v3928_v38  ;;  %v1602_v45 = vadd.f32 %v1596_v36, %v3929_v19  ;;  %v1605_v48 = vmul.f32 0.5, %v1601_v47 }
 0x68d   :  { %2033 = vtanh.f32 %v1603_v37  ;;  %v1604_v41 = vmul.f32 0.5, %v1600_v39 }
 0x68f   :  { %2035 = vtanh.f32 %v1604_v41 }
 0x690   :  { %2037 = vtanh.f32 %v1602_v45 }
 0x691   :  { %2039 = vtanh.f32 %v1605_v48 }
 0x69a   :  { %v2034_v49 = vpop.eup %2033 }
 0x69b   :  { %v1609_v50 = vmul.f32 0.5, %v2034_v49 }
 0x69c   :  { %v2036_v51 = vpop.eup %2035 }
 0x69d   :  { %v1612_v52 = vadd.f32 0.5, %v1609_v50  ;;  %v1610_v54 = vmul.f32 0.5, %v2036_v51  ;;  %v2038_v55 = vpop.eup %2037 }
 0x69e   :  { %v2040_v43 = vpop.eup %2039 }
 0x69f   :  { %v1613_v56 = vadd.f32 0.5, %v1610_v54  ;;  %v1617_v57 = vmul.f32 %v2038_v55, %v1612_v52  ;;  %v1611_v23 = vmul.f32 0.5, %v2040_v43 }
 0x6a1   :  { %v1616_v20 = vmul.f32 %v1613_v56, %v3495_v21  ;;  %v1614_v58 = vadd.f32 0.5, %v1611_v23  ;;  %v1804_v21 = vld [vmem:[%s3650_s4 + $0x38] sm:$0xff] }
 0x6a3   :  { %v3568_v42 = vadd.f32 %v1617_v57, %v1616_v20 }
 0x6a5   :  { %2041 = vtanh.f32 %v3568_v42 }
 0x6b2   :  { %v2042_v63 = vpop.eup %2041 }
 0x6b3   :  { %v1620_v1 = vmul.f32 %v2042_v63, %v1614_v58 }
 0x6b5   :  { %1693 = vmatmul.mubr.f32.vlgmr.msra.gmra.mxu0 %v1620_v1  ;;  %1764 = vmatmul.mubr.f32.vlgmr.msra.gmra.mxu1 %v1620_v1 }
 0x6b6   :  { %1937 = vmatpush3.msra.mxu0 %v1812_v35  ;;  %1968 = vmatprep.mubr.msk.f32.mxu0 %vm2118_vm1, %v3925_v3 }
 0x6b7   :  { %1938 = vmatprep.subr.mxu0 %v3925_v3 }
 0x6b8   :  { %1939 = vmatpush3.msra.mxu0 %v1811_v40 }
 0x6b9   :  { %1940 = vmatprep.subr.mxu0 %v3925_v3 }
 0x6ba   :  { %1941 = vmatpush3.msra.mxu0 %v1810_v28 }
 0x6bb   :  { %1942 = vmatprep.subr.mxu0 %v3925_v3 }
 0x6bc   :  { %1943 = vmatpush3.msra.mxu0 %v1809_v24 }
 0x6bd   :  { %1944 = vmatprep.subr.mxu0 %v3925_v3 }
 0x6be   :  { %1945 = vmatpush3.msra.mxu0 %v1808_v27 }
 0x6bf   :  { %1946 = vmatprep.subr.mxu0 %v3925_v3 }
 0x6c0   :  { %1947 = vmatpush3.msra.mxu0 %v1807_v29 }
 0x6c1   :  { %1948 = vmatprep.subr.mxu0 %v3925_v3 }
 0x6c2   :  { %1949 = vmatpush3.msra.mxu0 %v1806_v14 }
 0x6c3   :  { %1950 = vmatprep.subr.mxu0 %v3925_v3 }
 0x6c4   :  { %1951 = vmatpush3.msra.mxu0 %v1805_v25 }
 0x6c5   :  { %1952 = vmatprep.subr.mxu0 %v3925_v3 }
 0x6c6   :  { %1953 = vmatpush3.msra.mxu0 %v1804_v21 }
 0x6c7   :  { %1954 = vmatprep.subr.mxu0 %v3925_v3 }
 0x6c8   :  { %1955 = vmatpush3.msra.mxu0 %v1803_v60 }
 0x6c9   :  { %1956 = vmatprep.subr.mxu0 %v3925_v3 }
 0x6ca   :  { %1957 = vmatpush3.msra.mxu0 %v1802_v59 }
 0x6cb   :  { %1958 = vmatprep.subr.mxu0 %v3925_v3 }
 0x6cc   :  { %1959 = vmatpush3.msra.mxu0 %v1801_v61 }
 0x6cd   :  { %1960 = vmatprep.subr.mxu0 %v3925_v3 }
 0x6ce   :  { %1961 = vmatpush3.msra.mxu0 %v1800_v22 }
 0x6cf   :  { %1962 = vmatprep.subr.mxu0 %v3925_v3 }
 0x6d0   :  { %1963 = vmatpush3.msra.mxu0 %v1799_v0 }
 0x6d1   :  { %1964 = vmatprep.subr.mxu0 %v3925_v3 }
 0x6d2   :  { %1965 = vmatpush3.msra.mxu0 %v1798_v7 }
 0x6d3   :  { %1966 = vmatprep.subr.mxu0 %v3925_v3 }
 0x6d4   :  { %1967 = vmatpush3.msra.mxu0 %v1797_v16 }
 0x775   :  { %v1694_v2 = vpop.f32.mrf.mxu0  ;;  %v1765_v10 = vpop.f32.mrf.mxu1 }
 0x776   :  { %v1770_v15 = vadd.f32 %v1694_v2, %v3931_v26  ;;  %v1772_v6 = vadd.f32 %v1765_v10, %v3934_v9 }
 0x777   :  { %v1696_v13 = vpop.f32.mrf.mxu0  ;;  %v1767_v5 = vpop.f32.mrf.mxu1 }
 0x778   :  { %v1774_v12 = vmul.f32 0.5, %v1770_v15  ;;  %v1771_v44 = vadd.f32 %v1696_v13, %v3932_v17  ;;  %v1773_v4 = vadd.f32 %v1767_v5, %v3933_v18  ;;  %v1776_v53 = vmul.f32 0.5, %v1772_v6 }
 0x77a   :  { %2043 = vtanh.f32 %v1774_v12  ;;  %v1775_v62 = vmul.f32 0.5, %v1771_v44 }
 0x77c   :  { %2045 = vtanh.f32 %v1775_v62 }
 0x77d   :  { %2047 = vtanh.f32 %v1773_v4 }
 0x77e   :  { %2049 = vtanh.f32 %v1776_v53 }
 0x787   :  { %v2044_v8 = vpop.eup %2043 }
 0x788   :  { %v1780_v3 = vmul.f32 0.5, %v2044_v8 }
 0x789   :  { %v2046_v11 = vpop.eup %2045 }
 0x78a   :  { %v1783_v30 = vadd.f32 0.5, %v1780_v3  ;;  %v1781_v31 = vmul.f32 0.5, %v2046_v11  ;;  %v2048_v32 = vpop.eup %2047 }
 0x78b   :  { %v2050_v38 = vpop.eup %2049 }
 0x78c   :  { %v1784_v33 = vadd.f32 0.5, %v1781_v31  ;;  %v1788_v34 = vmul.f32 %v2048_v32, %v1783_v30  ;;  %v1782_v39 = vmul.f32 0.5, %v2050_v38 }
 0x78e   :  { %v1787_v36 = vmul.f32 %v1784_v33, %v3568_v42  ;;  %v1785_v41 = vadd.f32 0.5, %v1782_v39 }
 0x790   :  { %v1789_v37 = vadd.f32 %v1788_v34, %v1787_v36 }
 0x792   :  { %2051 = vtanh.f32 %v1789_v37 }
 0x79f   :  { %v2052_v19 = vpop.eup %2051 }
 0x7a0   :  { %v1791_v45 = vmul.f32 %v2052_v19, %v1785_v41 }
 0x7a2   :  { %1969 = vmatmul.mubr.f32.vlgmr.msra.gmra.mxu0 %v1791_v45 }
 0x862   :  { %v1886_v47 = vpop.f32.mrf.mxu0 }
 0x863   :  { %v1887_v48 = vadd.f32 %v1918_v46, %v1886_v47 }
 0x864   :  { %v1970_v49 = vpop.f32.mrf.mxu0 }
 0x865   :  { %1890 = vst [vmem:[%s3652_s6] sm:$0xff] %v1887_v48 }

</bundles_post_ra>
